<compile_context>
chip_gen: v7x
topology: tpu7x:2x2x1
jax: 0.10.0
libtpu: 0.0.40
codegen_flags: <defaults>
</compile_context>

<pallas_src>
import math
from functools import partial

import numpy as np
import jax
import jax.numpy as jnp
from jax.experimental import pallas as pl
from jax.experimental.pallas import tpu as pltpu


def _round_up(x, m):
    return ((x + m - 1) // m) * m


# ---------------------------------------------------------------------------
# tiling plan (deterministic from geometry; shared by init-time weight packing
# and by the forward pass)
# ---------------------------------------------------------------------------
_NB_MAX = 4                      # max batch rows folded into one block
_ACC_BYTES = 64 * 1024           # keep the f32 accumulator roughly vreg-resident
_WEIGHT_TILE_BYTES = 20 << 20    # double-buffered weight tile budget (v7x: 64 MiB VMEM)
_X_TILE_BYTES = 12 << 20         # double-buffered input chunk budget


def _plan(C_in, C_out, K, S, W_out, stride):
    R = C_in * K * K
    KT = K if stride == 1 else K * K            # taps packed in the input chunk
    KT_pad = _round_up(KT, 8)                   # sublane padding of chunk buffer
    S128 = _round_up(S, 128)
    acc_cap = _ACC_BYTES // (4 * _NB_MAX * max(C_out, 1))
    wt_cap = _WEIGHT_TILE_BYTES // (2 * 4 * R * _round_up(C_out, 8))
    x_cap = _X_TILE_BYTES // (2 * 4 * _NB_MAX * C_in * KT_pad)
    cap = min(acc_cap, wt_cap, x_cap, 2048)
    s_tile = max(128, (cap // 128) * 128)       # lane-dense (multiple of 128)
    s_tile = min(s_tile, S128)
    s_grid = _round_up(S, s_tile)
    num_s = s_grid // s_tile
    chunk = s_tile + (K - 1) * W_out if stride == 1 else s_tile
    return dict(R=R, KT=KT, s_tile=s_tile, s_grid=s_grid, num_s=num_s, chunk=chunk)


# ---------------------------------------------------------------------------
# kernel
# ---------------------------------------------------------------------------
def _make_lc2d_kernel(C_in, K, W_out, s_tile, stride):
    def kernel(xc_ref, w_ref, b_ref, o_ref):
        # xc_ref: (NB, C_in, KT, CHUNK)    pre-packed input taps for this (tile, batch block)
        # w_ref : (C_in, K*K, C_out, s_tile) per-position weights for this spatial tile
        # b_ref : (C_out, s_tile)
        # o_ref : (NB, C_out, s_tile)
        nb = o_ref.shape[0]
        c_out = o_ref.shape[1]
        acc0 = jnp.broadcast_to(
            b_ref[...].astype(jnp.float32)[None], (nb, c_out, s_tile))

        def accumulate_ci(ci, acc):
            # ci is a Python int on the unrolled path, a traced scalar on the
            # fori_loop path (dynamic index only on leading, untiled dims).
            for kj in range(K):
                if stride == 1:
                    x_row = xc_ref[:, ci, kj, :].astype(jnp.float32)      # (NB, CHUNK)
                for ki in range(K):
                    wv = w_ref[ci, ki * K + kj].astype(jnp.float32)       # (C_out, s_tile)
                    if stride == 1:
                        xv = x_row[:, ki * W_out: ki * W_out + s_tile]    # static lane shift
                    else:
                        xv = xc_ref[:, ci, ki * K + kj, :].astype(jnp.float32)
                    acc = acc + xv[:, None, :] * wv[None, :, :]
            return acc

        if C_in <= 8:
            acc = acc0
            for ci in range(C_in):       # fully static indexing, C_in*K*K taps
                acc = accumulate_ci(ci, acc)
        else:
            acc = jax.lax.fori_loop(0, C_in, accumulate_ci, acc0)

        o_ref[...] = acc.astype(o_ref.dtype)

    return kernel


# ---------------------------------------------------------------------------
# one-time parameter repack (do NOT call per forward)
# ---------------------------------------------------------------------------
def prepare_lc2d_params(weight, bias, kernel_size, stride=1):
    """(1,C_in,C_out,H,W,K,K) -> (C_in, K*K, C_out, S_grid); (1,C_out,H,W) -> (C_out, S_grid)."""
    _, C_in, C_out, H_out, W_out, K, _ = weight.shape
    assert K == kernel_size
    S = H_out * W_out
    p = _plan(C_in, C_out, K, S, W_out, stride)
    w = jnp.transpose(weight[0], (0, 4, 5, 1, 2, 3)).reshape(C_in, K * K, C_out, S)
    b = bias[0].reshape(C_out, S)
    pad = p["s_grid"] - S
    if pad:
        w = jnp.pad(w, ((0, 0), (0, 0), (0, 0), (0, pad)))
        b = jnp.pad(b, ((0, 0), (0, pad)))
    return w, b


# ---------------------------------------------------------------------------
# forward
# ---------------------------------------------------------------------------
@partial(jax.jit, static_argnames=("kernel_size", "stride", "padding"))
def locally_connected_2d(x, w_kernel, b_kernel, *, kernel_size, stride=1, padding=0):
    N, C_in, H, W = x.shape
    K = kernel_size
    C_out = b_kernel.shape[0]
    H_out = (H + 2 * padding - K) // stride + 1
    W_out = (W + 2 * padding - K) // stride + 1
    S = H_out * W_out
    p = _plan(C_in, C_out, K, S, W_out, stride)
    s_tile, s_grid = p["s_tile"], p["s_grid"]
    num_s, chunk, KT = p["num_s"], p["chunk"], p["KT"]
    assert w_kernel.shape == (C_in, K * K, C_out, s_grid), "params not packed for this geometry"
    assert b_kernel.shape == (C_out, s_grid), "params not packed for this geometry"

    NB = min(N, _NB_MAX)
    N_pad = _round_up(N, NB)
    n_blocks = N_pad // NB

    # ---- input packing: K-way kj-unfold (not K*K im2col) for stride==1 ------
    xp = jnp.pad(x, ((0, 0), (0, 0), (padding, padding), (padding, padding)))
    if stride == 1:
        H_eff = H_out + K - 1                                    # reachable rows
        cols = [xp[:, :, :H_eff, kj:kj + W_out] for kj in range(K)]
        xu = jnp.stack(cols, axis=2).reshape(N, C_in, K, H_eff * W_out)
        L_req = s_grid + (K - 1) * W_out
    else:
        # TODO(synk): stride>1 falls back to full K*K im2col packing; a K-only
        # packing would need strided row reads + an in-kernel relayout.
        taps = []
        for ki in range(K):
            for kj in range(K):
                taps.append(xp[:, :,
                               ki:ki + stride * (H_out - 1) + 1:stride,
                               kj:kj + stride * (W_out - 1) + 1:stride])
        xu = jnp.stack(taps, axis=2).reshape(N, C_in, K * K, S)
        L_req = s_grid
    L = xu.shape[-1]
    if L_req > L:
        xu = jnp.pad(xu, ((0, 0), (0, 0), (0, 0), (0, L_req - L)))
    if N_pad > N:
        xu = jnp.pad(xu, ((0, N_pad - N), (0, 0), (0, 0), (0, 0)))
    # Per-tile (slightly overlapping) chunks -> BlockSpec-tileable, no dynamic
    # lane slicing inside the kernel.
    xc = jnp.stack([xu[..., t * s_tile: t * s_tile + chunk] for t in range(num_s)],
                   axis=0)                                       # (num_s,N_pad,C_in,KT,chunk)
    xc = xc.reshape(num_s * N_pad, C_in, KT, chunk)

    kernel = _make_lc2d_kernel(C_in, K, W_out, s_tile, stride)

    # VMEM footprint of one pipelined step (double-buffered tiles + accumulator).
    KT_pad = _round_up(KT, 8)
    chunk_pad = _round_up(chunk, 128)
    co_pad = _round_up(C_out, 8)
    vmem_need = 2 * 4 * (C_in * K * K * co_pad * s_tile        # weight tile
                         + NB * C_in * KT_pad * chunk_pad      # input chunk
                         + co_pad * s_tile                     # bias tile
                         + NB * co_pad * s_tile) + _ACC_BYTES  # output tile + acc
    vmem_limit = int(min(max(vmem_need * 5 // 4 + (2 << 20), 16 << 20), 64 << 20))

    out = pl.pallas_call(
        kernel,
        out_shape=jax.ShapeDtypeStruct((N_pad, C_out, s_grid), x.dtype),
        grid_spec=pltpu.PrefetchScalarGridSpec(
            num_scalar_prefetch=0,
            grid=(num_s, n_blocks),                 # batch innermost -> weight tile reuse
            in_specs=[
                pl.BlockSpec((NB, C_in, KT, chunk),
                             lambda s, n: (s * n_blocks + n, 0, 0, 0)),
                pl.BlockSpec((C_in, K * K, C_out, s_tile),
                             lambda s, n: (0, 0, 0, s)),
                pl.BlockSpec((C_out, s_tile), lambda s, n: (0, s)),
            ],
            out_specs=pl.BlockSpec((NB, C_out, s_tile), lambda s, n: (n, 0, s)),
        ),
        compiler_params=pltpu.CompilerParams(
            dimension_semantics=("parallel", "parallel"),
            vmem_limit_bytes=vmem_limit,
        ),
    )(xc, w_kernel, b_kernel)

    return out[:N, :, :S].reshape(N, C_out, H_out, W_out)


# ---------------------------------------------------------------------------
# reference + self-test
# ---------------------------------------------------------------------------
def _reference_np(x, weight, bias, K, stride, padding):
    x = np.asarray(x); w = np.asarray(weight); b = np.asarray(bias)
    N, C_in, H, W = x.shape
    C_out, H_out, W_out = w.shape[2], w.shape[3], w.shape[4]
    xp = np.pad(x, ((0, 0), (0, 0), (padding, padding), (padding, padding)))
    y = np.zeros((N, C_out, H_out, W_out), dtype=np.float32)
    for i in range(H_out):
        for j in range(W_out):
            patch = xp[:, :, i * stride:i * stride + K, j * stride:j * stride + K]
            y[:, :, i, j] = np.einsum('nckl,cmkl->nm', patch, w[0, :, :, i, j, :, :])
    return y + b


if __name__ == "__main__":
    N, C_in, C_out = 2, 4, 8
    H = W = 16
    K = 3

    key = jax.random.PRNGKey(0)

    # main path (stride=1 fast path) + strided fallback path
    for stride, padding in [(1, 1), (2, 1)]:
        H_out = (H + 2 * padding - K) // stride + 1
        W_out = (W + 2 * padding - K) // stride + 1
        key, kx, kw, kb = jax.random.split(key, 4)
        x = jax.random.normal(kx, (N, C_in, H, W), dtype=jnp.float32)
        weight = jax.random.normal(
            kw, (1, C_in, C_out, H_out, W_out, K, K), dtype=jnp.float32)
        bias = jax.random.normal(kb, (1, C_out, H_out, W_out), dtype=jnp.float32)

        # one-time parameter repack (kernel layout), then Pallas forward
        w_k, b_k = prepare_lc2d_params(weight, bias, K, stride=stride)
        y = locally_connected_2d(x, w_k, b_k,
                                 kernel_size=K, stride=stride, padding=padding)
        y = jax.block_until_ready(y)

        y_ref = _reference_np(x, weight, bias, K, stride, padding)
        assert y.shape == (N, C_out, H_out, W_out)
        np.testing.assert_allclose(np.asarray(y), y_ref, rtol=1e-4, atol=1e-4)

    print("KERNEL_OK")
</pallas_src>

<mosaic_0001>
module attributes {stable_mosaic.version = 11 : i64} {
  func.func @kernel(%arg0: i32, %arg1: i32, %arg2: memref<2x4x3x288xf32, #tpu.memory_space<vmem>>, %arg3: memref<4x9x8x256xf32, #tpu.memory_space<vmem>>, %arg4: memref<8x256xf32, #tpu.memory_space<vmem>>, %arg5: memref<2x8x256xf32, #tpu.memory_space<vmem>>) attributes {dimension_semantics = [#tpu.dimension_semantics<parallel>, #tpu.dimension_semantics<parallel>], iteration_bounds = array<i64: 1, 1>, scalar_prefetch = 0 : i64, scratch_operands = 0 : i64, tpu.core_type = #tpu.core_type<tc>, window_params = [{transform_indices = @transform_0, window_bounds = array<i64: 2, 4, 3, 288>}, {transform_indices = @transform_1, window_bounds = array<i64: 4, 9, 8, 256>}, {transform_indices = @transform_2, window_bounds = array<i64: 8, 256>}, {transform_indices = @transform_3, window_bounds = array<i64: 2, 8, 256>}]} {
    %c0 = arith.constant 0 : index
    %c0_0 = arith.constant 0 : index
    %0 = vector.load %arg4[%c0, %c0_0] : memref<8x256xf32, #tpu.memory_space<vmem>>, vector<8x256xf32>
    %1 = vector.shape_cast %0 : vector<8x256xf32> to vector<1x8x256xf32>
    %2 = vector.shape_cast %1 : vector<1x8x256xf32> to vector<1x8x256xf32>
    %3 = vector.broadcast %2 : vector<1x8x256xf32> to vector<2x8x256xf32>
    %c0_1 = arith.constant 0 : index
    %c0_2 = arith.constant 0 : index
    %c0_3 = arith.constant 0 : index
    %c0_4 = arith.constant 0 : index
    %4 = vector.load %arg2[%c0_1, %c0_2, %c0_3, %c0_4] : memref<2x4x3x288xf32, #tpu.memory_space<vmem>>, vector<2x1x1x288xf32>
    %5 = vector.shape_cast %4 : vector<2x1x1x288xf32> to vector<2x288xf32>
    %c0_5 = arith.constant 0 : index
    %c0_6 = arith.constant 0 : index
    %c0_7 = arith.constant 0 : index
    %c0_8 = arith.constant 0 : index
    %6 = vector.load %arg3[%c0_5, %c0_6, %c0_7, %c0_8] : memref<4x9x8x256xf32, #tpu.memory_space<vmem>>, vector<1x1x8x256xf32>
    %7 = vector.shape_cast %6 : vector<1x1x8x256xf32> to vector<8x256xf32>
    %8 = vector.extract_strided_slice %5 {offsets = [0, 0], sizes = [2, 256], strides = [1, 1]} : vector<2x288xf32> to vector<2x256xf32>
    %9 = vector.shape_cast %8 : vector<2x256xf32> to vector<2x1x256xf32>
    %10 = vector.shape_cast %7 : vector<8x256xf32> to vector<1x8x256xf32>
    %11 = vector.broadcast %9 : vector<2x1x256xf32> to vector<2x8x256xf32>
    %12 = vector.broadcast %10 : vector<1x8x256xf32> to vector<2x8x256xf32>
    %13 = arith.mulf %11, %12 : vector<2x8x256xf32>
    %14 = arith.addf %3, %13 : vector<2x8x256xf32>
    %c0_9 = arith.constant 0 : index
    %c3 = arith.constant 3 : index
    %c0_10 = arith.constant 0 : index
    %c0_11 = arith.constant 0 : index
    %15 = vector.load %arg3[%c0_9, %c3, %c0_10, %c0_11] : memref<4x9x8x256xf32, #tpu.memory_space<vmem>>, vector<1x1x8x256xf32>
    %16 = vector.shape_cast %15 : vector<1x1x8x256xf32> to vector<8x256xf32>
    %17 = vector.extract_strided_slice %5 {offsets = [0, 16], sizes = [2, 256], strides = [1, 1]} : vector<2x288xf32> to vector<2x256xf32>
    %18 = vector.shape_cast %17 : vector<2x256xf32> to vector<2x1x256xf32>
    %19 = vector.shape_cast %16 : vector<8x256xf32> to vector<1x8x256xf32>
    %20 = vector.broadcast %18 : vector<2x1x256xf32> to vector<2x8x256xf32>
    %21 = vector.broadcast %19 : vector<1x8x256xf32> to vector<2x8x256xf32>
    %22 = arith.mulf %20, %21 : vector<2x8x256xf32>
    %23 = arith.addf %14, %22 : vector<2x8x256xf32>
    %c0_12 = arith.constant 0 : index
    %c6 = arith.constant 6 : index
    %c0_13 = arith.constant 0 : index
    %c0_14 = arith.constant 0 : index
    %24 = vector.load %arg3[%c0_12, %c6, %c0_13, %c0_14] : memref<4x9x8x256xf32, #tpu.memory_space<vmem>>, vector<1x1x8x256xf32>
    %25 = vector.shape_cast %24 : vector<1x1x8x256xf32> to vector<8x256xf32>
    %26 = vector.extract_strided_slice %5 {offsets = [0, 32], sizes = [2, 256], strides = [1, 1]} : vector<2x288xf32> to vector<2x256xf32>
    %27 = vector.shape_cast %26 : vector<2x256xf32> to vector<2x1x256xf32>
    %28 = vector.shape_cast %25 : vector<8x256xf32> to vector<1x8x256xf32>
    %29 = vector.broadcast %27 : vector<2x1x256xf32> to vector<2x8x256xf32>
    %30 = vector.broadcast %28 : vector<1x8x256xf32> to vector<2x8x256xf32>
    %31 = arith.mulf %29, %30 : vector<2x8x256xf32>
    %32 = arith.addf %23, %31 : vector<2x8x256xf32>
    %c0_15 = arith.constant 0 : index
    %c0_16 = arith.constant 0 : index
    %c1 = arith.constant 1 : index
    %c0_17 = arith.constant 0 : index
    %33 = vector.load %arg2[%c0_15, %c0_16, %c1, %c0_17] : memref<2x4x3x288xf32, #tpu.memory_space<vmem>>, vector<2x1x1x288xf32>
    %34 = vector.shape_cast %33 : vector<2x1x1x288xf32> to vector<2x288xf32>
    %c0_18 = arith.constant 0 : index
    %c1_19 = arith.constant 1 : index
    %c0_20 = arith.constant 0 : index
    %c0_21 = arith.constant 0 : index
    %35 = vector.load %arg3[%c0_18, %c1_19, %c0_20, %c0_21] : memref<4x9x8x256xf32, #tpu.memory_space<vmem>>, vector<1x1x8x256xf32>
    %36 = vector.shape_cast %35 : vector<1x1x8x256xf32> to vector<8x256xf32>
    %37 = vector.extract_strided_slice %34 {offsets = [0, 0], sizes = [2, 256], strides = [1, 1]} : vector<2x288xf32> to vector<2x256xf32>
    %38 = vector.shape_cast %37 : vector<2x256xf32> to vector<2x1x256xf32>
    %39 = vector.shape_cast %36 : vector<8x256xf32> to vector<1x8x256xf32>
    %40 = vector.broadcast %38 : vector<2x1x256xf32> to vector<2x8x256xf32>
    %41 = vector.broadcast %39 : vector<1x8x256xf32> to vector<2x8x256xf32>
    %42 = arith.mulf %40, %41 : vector<2x8x256xf32>
    %43 = arith.addf %32, %42 : vector<2x8x256xf32>
    %c0_22 = arith.constant 0 : index
    %c4 = arith.constant 4 : index
    %c0_23 = arith.constant 0 : index
    %c0_24 = arith.constant 0 : index
    %44 = vector.load %arg3[%c0_22, %c4, %c0_23, %c0_24] : memref<4x9x8x256xf32, #tpu.memory_space<vmem>>, vector<1x1x8x256xf32>
    %45 = vector.shape_cast %44 : vector<1x1x8x256xf32> to vector<8x256xf32>
    %46 = vector.extract_strided_slice %34 {offsets = [0, 16], sizes = [2, 256], strides = [1, 1]} : vector<2x288xf32> to vector<2x256xf32>
    %47 = vector.shape_cast %46 : vector<2x256xf32> to vector<2x1x256xf32>
    %48 = vector.shape_cast %45 : vector<8x256xf32> to vector<1x8x256xf32>
    %49 = vector.broadcast %47 : vector<2x1x256xf32> to vector<2x8x256xf32>
    %50 = vector.broadcast %48 : vector<1x8x256xf32> to vector<2x8x256xf32>
    %51 = arith.mulf %49, %50 : vector<2x8x256xf32>
    %52 = arith.addf %43, %51 : vector<2x8x256xf32>
    %c0_25 = arith.constant 0 : index
    %c7 = arith.constant 7 : index
    %c0_26 = arith.constant 0 : index
    %c0_27 = arith.constant 0 : index
    %53 = vector.load %arg3[%c0_25, %c7, %c0_26, %c0_27] : memref<4x9x8x256xf32, #tpu.memory_space<vmem>>, vector<1x1x8x256xf32>
    %54 = vector.shape_cast %53 : vector<1x1x8x256xf32> to vector<8x256xf32>
    %55 = vector.extract_strided_slice %34 {offsets = [0, 32], sizes = [2, 256], strides = [1, 1]} : vector<2x288xf32> to vector<2x256xf32>
    %56 = vector.shape_cast %55 : vector<2x256xf32> to vector<2x1x256xf32>
    %57 = vector.shape_cast %54 : vector<8x256xf32> to vector<1x8x256xf32>
    %58 = vector.broadcast %56 : vector<2x1x256xf32> to vector<2x8x256xf32>
    %59 = vector.broadcast %57 : vector<1x8x256xf32> to vector<2x8x256xf32>
    %60 = arith.mulf %58, %59 : vector<2x8x256xf32>
    %61 = arith.addf %52, %60 : vector<2x8x256xf32>
    %c0_28 = arith.constant 0 : index
    %c0_29 = arith.constant 0 : index
    %c2 = arith.constant 2 : index
    %c0_30 = arith.constant 0 : index
    %62 = vector.load %arg2[%c0_28, %c0_29, %c2, %c0_30] : memref<2x4x3x288xf32, #tpu.memory_space<vmem>>, vector<2x1x1x288xf32>
    %63 = vector.shape_cast %62 : vector<2x1x1x288xf32> to vector<2x288xf32>
    %c0_31 = arith.constant 0 : index
    %c2_32 = arith.constant 2 : index
    %c0_33 = arith.constant 0 : index
    %c0_34 = arith.constant 0 : index
    %64 = vector.load %arg3[%c0_31, %c2_32, %c0_33, %c0_34] : memref<4x9x8x256xf32, #tpu.memory_space<vmem>>, vector<1x1x8x256xf32>
    %65 = vector.shape_cast %64 : vector<1x1x8x256xf32> to vector<8x256xf32>
    %66 = vector.extract_strided_slice %63 {offsets = [0, 0], sizes = [2, 256], strides = [1, 1]} : vector<2x288xf32> to vector<2x256xf32>
    %67 = vector.shape_cast %66 : vector<2x256xf32> to vector<2x1x256xf32>
    %68 = vector.shape_cast %65 : vector<8x256xf32> to vector<1x8x256xf32>
    %69 = vector.broadcast %67 : vector<2x1x256xf32> to vector<2x8x256xf32>
    %70 = vector.broadcast %68 : vector<1x8x256xf32> to vector<2x8x256xf32>
    %71 = arith.mulf %69, %70 : vector<2x8x256xf32>
    %72 = arith.addf %61, %71 : vector<2x8x256xf32>
    %c0_35 = arith.constant 0 : index
    %c5 = arith.constant 5 : index
    %c0_36 = arith.constant 0 : index
    %c0_37 = arith.constant 0 : index
    %73 = vector.load %arg3[%c0_35, %c5, %c0_36, %c0_37] : memref<4x9x8x256xf32, #tpu.memory_space<vmem>>, vector<1x1x8x256xf32>
    %74 = vector.shape_cast %73 : vector<1x1x8x256xf32> to vector<8x256xf32>
    %75 = vector.extract_strided_slice %63 {offsets = [0, 16], sizes = [2, 256], strides = [1, 1]} : vector<2x288xf32> to vector<2x256xf32>
    %76 = vector.shape_cast %75 : vector<2x256xf32> to vector<2x1x256xf32>
    %77 = vector.shape_cast %74 : vector<8x256xf32> to vector<1x8x256xf32>
    %78 = vector.broadcast %76 : vector<2x1x256xf32> to vector<2x8x256xf32>
    %79 = vector.broadcast %77 : vector<1x8x256xf32> to vector<2x8x256xf32>
    %80 = arith.mulf %78, %79 : vector<2x8x256xf32>
    %81 = arith.addf %72, %80 : vector<2x8x256xf32>
    %c0_38 = arith.constant 0 : index
    %c8 = arith.constant 8 : index
    %c0_39 = arith.constant 0 : index
    %c0_40 = arith.constant 0 : index
    %82 = vector.load %arg3[%c0_38, %c8, %c0_39, %c0_40] : memref<4x9x8x256xf32, #tpu.memory_space<vmem>>, vector<1x1x8x256xf32>
    %83 = vector.shape_cast %82 : vector<1x1x8x256xf32> to vector<8x256xf32>
    %84 = vector.extract_strided_slice %63 {offsets = [0, 32], sizes = [2, 256], strides = [1, 1]} : vector<2x288xf32> to vector<2x256xf32>
    %85 = vector.shape_cast %84 : vector<2x256xf32> to vector<2x1x256xf32>
    %86 = vector.shape_cast %83 : vector<8x256xf32> to vector<1x8x256xf32>
    %87 = vector.broadcast %85 : vector<2x1x256xf32> to vector<2x8x256xf32>
    %88 = vector.broadcast %86 : vector<1x8x256xf32> to vector<2x8x256xf32>
    %89 = arith.mulf %87, %88 : vector<2x8x256xf32>
    %90 = arith.addf %81, %89 : vector<2x8x256xf32>
    %c0_41 = arith.constant 0 : index
    %c1_42 = arith.constant 1 : index
    %c0_43 = arith.constant 0 : index
    %c0_44 = arith.constant 0 : index
    %91 = vector.load %arg2[%c0_41, %c1_42, %c0_43, %c0_44] : memref<2x4x3x288xf32, #tpu.memory_space<vmem>>, vector<2x1x1x288xf32>
    %92 = vector.shape_cast %91 : vector<2x1x1x288xf32> to vector<2x288xf32>
    %c1_45 = arith.constant 1 : index
    %c0_46 = arith.constant 0 : index
    %c0_47 = arith.constant 0 : index
    %c0_48 = arith.constant 0 : index
    %93 = vector.load %arg3[%c1_45, %c0_46, %c0_47, %c0_48] : memref<4x9x8x256xf32, #tpu.memory_space<vmem>>, vector<1x1x8x256xf32>
    %94 = vector.shape_cast %93 : vector<1x1x8x256xf32> to vector<8x256xf32>
    %95 = vector.extract_strided_slice %92 {offsets = [0, 0], sizes = [2, 256], strides = [1, 1]} : vector<2x288xf32> to vector<2x256xf32>
    %96 = vector.shape_cast %95 : vector<2x256xf32> to vector<2x1x256xf32>
    %97 = vector.shape_cast %94 : vector<8x256xf32> to vector<1x8x256xf32>
    %98 = vector.broadcast %96 : vector<2x1x256xf32> to vector<2x8x256xf32>
    %99 = vector.broadcast %97 : vector<1x8x256xf32> to vector<2x8x256xf32>
    %100 = arith.mulf %98, %99 : vector<2x8x256xf32>
    %101 = arith.addf %90, %100 : vector<2x8x256xf32>
    %c1_49 = arith.constant 1 : index
    %c3_50 = arith.constant 3 : index
    %c0_51 = arith.constant 0 : index
    %c0_52 = arith.constant 0 : index
    %102 = vector.load %arg3[%c1_49, %c3_50, %c0_51, %c0_52] : memref<4x9x8x256xf32, #tpu.memory_space<vmem>>, vector<1x1x8x256xf32>
    %103 = vector.shape_cast %102 : vector<1x1x8x256xf32> to vector<8x256xf32>
    %104 = vector.extract_strided_slice %92 {offsets = [0, 16], sizes = [2, 256], strides = [1, 1]} : vector<2x288xf32> to vector<2x256xf32>
    %105 = vector.shape_cast %104 : vector<2x256xf32> to vector<2x1x256xf32>
    %106 = vector.shape_cast %103 : vector<8x256xf32> to vector<1x8x256xf32>
    %107 = vector.broadcast %105 : vector<2x1x256xf32> to vector<2x8x256xf32>
    %108 = vector.broadcast %106 : vector<1x8x256xf32> to vector<2x8x256xf32>
    %109 = arith.mulf %107, %108 : vector<2x8x256xf32>
    %110 = arith.addf %101, %109 : vector<2x8x256xf32>
    %c1_53 = arith.constant 1 : index
    %c6_54 = arith.constant 6 : index
    %c0_55 = arith.constant 0 : index
    %c0_56 = arith.constant 0 : index
    %111 = vector.load %arg3[%c1_53, %c6_54, %c0_55, %c0_56] : memref<4x9x8x256xf32, #tpu.memory_space<vmem>>, vector<1x1x8x256xf32>
    %112 = vector.shape_cast %111 : vector<1x1x8x256xf32> to vector<8x256xf32>
    %113 = vector.extract_strided_slice %92 {offsets = [0, 32], sizes = [2, 256], strides = [1, 1]} : vector<2x288xf32> to vector<2x256xf32>
    %114 = vector.shape_cast %113 : vector<2x256xf32> to vector<2x1x256xf32>
    %115 = vector.shape_cast %112 : vector<8x256xf32> to vector<1x8x256xf32>
    %116 = vector.broadcast %114 : vector<2x1x256xf32> to vector<2x8x256xf32>
    %117 = vector.broadcast %115 : vector<1x8x256xf32> to vector<2x8x256xf32>
    %118 = arith.mulf %116, %117 : vector<2x8x256xf32>
    %119 = arith.addf %110, %118 : vector<2x8x256xf32>
    %c0_57 = arith.constant 0 : index
    %c1_58 = arith.constant 1 : index
    %c1_59 = arith.constant 1 : index
    %c0_60 = arith.constant 0 : index
    %120 = vector.load %arg2[%c0_57, %c1_58, %c1_59, %c0_60] : memref<2x4x3x288xf32, #tpu.memory_space<vmem>>, vector<2x1x1x288xf32>
    %121 = vector.shape_cast %120 : vector<2x1x1x288xf32> to vector<2x288xf32>
    %c1_61 = arith.constant 1 : index
    %c1_62 = arith.constant 1 : index
    %c0_63 = arith.constant 0 : index
    %c0_64 = arith.constant 0 : index
    %122 = vector.load %arg3[%c1_61, %c1_62, %c0_63, %c0_64] : memref<4x9x8x256xf32, #tpu.memory_space<vmem>>, vector<1x1x8x256xf32>
    %123 = vector.shape_cast %122 : vector<1x1x8x256xf32> to vector<8x256xf32>
    %124 = vector.extract_strided_slice %121 {offsets = [0, 0], sizes = [2, 256], strides = [1, 1]} : vector<2x288xf32> to vector<2x256xf32>
    %125 = vector.shape_cast %124 : vector<2x256xf32> to vector<2x1x256xf32>
    %126 = vector.shape_cast %123 : vector<8x256xf32> to vector<1x8x256xf32>
    %127 = vector.broadcast %125 : vector<2x1x256xf32> to vector<2x8x256xf32>
    %128 = vector.broadcast %126 : vector<1x8x256xf32> to vector<2x8x256xf32>
    %129 = arith.mulf %127, %128 : vector<2x8x256xf32>
    %130 = arith.addf %119, %129 : vector<2x8x256xf32>
    %c1_65 = arith.constant 1 : index
    %c4_66 = arith.constant 4 : index
    %c0_67 = arith.constant 0 : index
    %c0_68 = arith.constant 0 : index
    %131 = vector.load %arg3[%c1_65, %c4_66, %c0_67, %c0_68] : memref<4x9x8x256xf32, #tpu.memory_space<vmem>>, vector<1x1x8x256xf32>
    %132 = vector.shape_cast %131 : vector<1x1x8x256xf32> to vector<8x256xf32>
    %133 = vector.extract_strided_slice %121 {offsets = [0, 16], sizes = [2, 256], strides = [1, 1]} : vector<2x288xf32> to vector<2x256xf32>
    %134 = vector.shape_cast %133 : vector<2x256xf32> to vector<2x1x256xf32>
    %135 = vector.shape_cast %132 : vector<8x256xf32> to vector<1x8x256xf32>
    %136 = vector.broadcast %134 : vector<2x1x256xf32> to vector<2x8x256xf32>
    %137 = vector.broadcast %135 : vector<1x8x256xf32> to vector<2x8x256xf32>
    %138 = arith.mulf %136, %137 : vector<2x8x256xf32>
    %139 = arith.addf %130, %138 : vector<2x8x256xf32>
    %c1_69 = arith.constant 1 : index
    %c7_70 = arith.constant 7 : index
    %c0_71 = arith.constant 0 : index
    %c0_72 = arith.constant 0 : index
    %140 = vector.load %arg3[%c1_69, %c7_70, %c0_71, %c0_72] : memref<4x9x8x256xf32, #tpu.memory_space<vmem>>, vector<1x1x8x256xf32>
    %141 = vector.shape_cast %140 : vector<1x1x8x256xf32> to vector<8x256xf32>
    %142 = vector.extract_strided_slice %121 {offsets = [0, 32], sizes = [2, 256], strides = [1, 1]} : vector<2x288xf32> to vector<2x256xf32>
    %143 = vector.shape_cast %142 : vector<2x256xf32> to vector<2x1x256xf32>
    %144 = vector.shape_cast %141 : vector<8x256xf32> to vector<1x8x256xf32>
    %145 = vector.broadcast %143 : vector<2x1x256xf32> to vector<2x8x256xf32>
    %146 = vector.broadcast %144 : vector<1x8x256xf32> to vector<2x8x256xf32>
    %147 = arith.mulf %145, %146 : vector<2x8x256xf32>
    %148 = arith.addf %139, %147 : vector<2x8x256xf32>
    %c0_73 = arith.constant 0 : index
    %c1_74 = arith.constant 1 : index
    %c2_75 = arith.constant 2 : index
    %c0_76 = arith.constant 0 : index
    %149 = vector.load %arg2[%c0_73, %c1_74, %c2_75, %c0_76] : memref<2x4x3x288xf32, #tpu.memory_space<vmem>>, vector<2x1x1x288xf32>
    %150 = vector.shape_cast %149 : vector<2x1x1x288xf32> to vector<2x288xf32>
    %c1_77 = arith.constant 1 : index
    %c2_78 = arith.constant 2 : index
    %c0_79 = arith.constant 0 : index
    %c0_80 = arith.constant 0 : index
    %151 = vector.load %arg3[%c1_77, %c2_78, %c0_79, %c0_80] : memref<4x9x8x256xf32, #tpu.memory_space<vmem>>, vector<1x1x8x256xf32>
    %152 = vector.shape_cast %151 : vector<1x1x8x256xf32> to vector<8x256xf32>
    %153 = vector.extract_strided_slice %150 {offsets = [0, 0], sizes = [2, 256], strides = [1, 1]} : vector<2x288xf32> to vector<2x256xf32>
    %154 = vector.shape_cast %153 : vector<2x256xf32> to vector<2x1x256xf32>
    %155 = vector.shape_cast %152 : vector<8x256xf32> to vector<1x8x256xf32>
    %156 = vector.broadcast %154 : vector<2x1x256xf32> to vector<2x8x256xf32>
    %157 = vector.broadcast %155 : vector<1x8x256xf32> to vector<2x8x256xf32>
    %158 = arith.mulf %156, %157 : vector<2x8x256xf32>
    %159 = arith.addf %148, %158 : vector<2x8x256xf32>
    %c1_81 = arith.constant 1 : index
    %c5_82 = arith.constant 5 : index
    %c0_83 = arith.constant 0 : index
    %c0_84 = arith.constant 0 : index
    %160 = vector.load %arg3[%c1_81, %c5_82, %c0_83, %c0_84] : memref<4x9x8x256xf32, #tpu.memory_space<vmem>>, vector<1x1x8x256xf32>
    %161 = vector.shape_cast %160 : vector<1x1x8x256xf32> to vector<8x256xf32>
    %162 = vector.extract_strided_slice %150 {offsets = [0, 16], sizes = [2, 256], strides = [1, 1]} : vector<2x288xf32> to vector<2x256xf32>
    %163 = vector.shape_cast %162 : vector<2x256xf32> to vector<2x1x256xf32>
    %164 = vector.shape_cast %161 : vector<8x256xf32> to vector<1x8x256xf32>
    %165 = vector.broadcast %163 : vector<2x1x256xf32> to vector<2x8x256xf32>
    %166 = vector.broadcast %164 : vector<1x8x256xf32> to vector<2x8x256xf32>
    %167 = arith.mulf %165, %166 : vector<2x8x256xf32>
    %168 = arith.addf %159, %167 : vector<2x8x256xf32>
    %c1_85 = arith.constant 1 : index
    %c8_86 = arith.constant 8 : index
    %c0_87 = arith.constant 0 : index
    %c0_88 = arith.constant 0 : index
    %169 = vector.load %arg3[%c1_85, %c8_86, %c0_87, %c0_88] : memref<4x9x8x256xf32, #tpu.memory_space<vmem>>, vector<1x1x8x256xf32>
    %170 = vector.shape_cast %169 : vector<1x1x8x256xf32> to vector<8x256xf32>
    %171 = vector.extract_strided_slice %150 {offsets = [0, 32], sizes = [2, 256], strides = [1, 1]} : vector<2x288xf32> to vector<2x256xf32>
    %172 = vector.shape_cast %171 : vector<2x256xf32> to vector<2x1x256xf32>
    %173 = vector.shape_cast %170 : vector<8x256xf32> to vector<1x8x256xf32>
    %174 = vector.broadcast %172 : vector<2x1x256xf32> to vector<2x8x256xf32>
    %175 = vector.broadcast %173 : vector<1x8x256xf32> to vector<2x8x256xf32>
    %176 = arith.mulf %174, %175 : vector<2x8x256xf32>
    %177 = arith.addf %168, %176 : vector<2x8x256xf32>
    %c0_89 = arith.constant 0 : index
    %c2_90 = arith.constant 2 : index
    %c0_91 = arith.constant 0 : index
    %c0_92 = arith.constant 0 : index
    %178 = vector.load %arg2[%c0_89, %c2_90, %c0_91, %c0_92] : memref<2x4x3x288xf32, #tpu.memory_space<vmem>>, vector<2x1x1x288xf32>
    %179 = vector.shape_cast %178 : vector<2x1x1x288xf32> to vector<2x288xf32>
    %c2_93 = arith.constant 2 : index
    %c0_94 = arith.constant 0 : index
    %c0_95 = arith.constant 0 : index
    %c0_96 = arith.constant 0 : index
    %180 = vector.load %arg3[%c2_93, %c0_94, %c0_95, %c0_96] : memref<4x9x8x256xf32, #tpu.memory_space<vmem>>, vector<1x1x8x256xf32>
    %181 = vector.shape_cast %180 : vector<1x1x8x256xf32> to vector<8x256xf32>
    %182 = vector.extract_strided_slice %179 {offsets = [0, 0], sizes = [2, 256], strides = [1, 1]} : vector<2x288xf32> to vector<2x256xf32>
    %183 = vector.shape_cast %182 : vector<2x256xf32> to vector<2x1x256xf32>
    %184 = vector.shape_cast %181 : vector<8x256xf32> to vector<1x8x256xf32>
    %185 = vector.broadcast %183 : vector<2x1x256xf32> to vector<2x8x256xf32>
    %186 = vector.broadcast %184 : vector<1x8x256xf32> to vector<2x8x256xf32>
    %187 = arith.mulf %185, %186 : vector<2x8x256xf32>
    %188 = arith.addf %177, %187 : vector<2x8x256xf32>
    %c2_97 = arith.constant 2 : index
    %c3_98 = arith.constant 3 : index
    %c0_99 = arith.constant 0 : index
    %c0_100 = arith.constant 0 : index
    %189 = vector.load %arg3[%c2_97, %c3_98, %c0_99, %c0_100] : memref<4x9x8x256xf32, #tpu.memory_space<vmem>>, vector<1x1x8x256xf32>
    %190 = vector.shape_cast %189 : vector<1x1x8x256xf32> to vector<8x256xf32>
    %191 = vector.extract_strided_slice %179 {offsets = [0, 16], sizes = [2, 256], strides = [1, 1]} : vector<2x288xf32> to vector<2x256xf32>
    %192 = vector.shape_cast %191 : vector<2x256xf32> to vector<2x1x256xf32>
    %193 = vector.shape_cast %190 : vector<8x256xf32> to vector<1x8x256xf32>
    %194 = vector.broadcast %192 : vector<2x1x256xf32> to vector<2x8x256xf32>
    %195 = vector.broadcast %193 : vector<1x8x256xf32> to vector<2x8x256xf32>
    %196 = arith.mulf %194, %195 : vector<2x8x256xf32>
    %197 = arith.addf %188, %196 : vector<2x8x256xf32>
    %c2_101 = arith.constant 2 : index
    %c6_102 = arith.constant 6 : index
    %c0_103 = arith.constant 0 : index
    %c0_104 = arith.constant 0 : index
    %198 = vector.load %arg3[%c2_101, %c6_102, %c0_103, %c0_104] : memref<4x9x8x256xf32, #tpu.memory_space<vmem>>, vector<1x1x8x256xf32>
    %199 = vector.shape_cast %198 : vector<1x1x8x256xf32> to vector<8x256xf32>
    %200 = vector.extract_strided_slice %179 {offsets = [0, 32], sizes = [2, 256], strides = [1, 1]} : vector<2x288xf32> to vector<2x256xf32>
    %201 = vector.shape_cast %200 : vector<2x256xf32> to vector<2x1x256xf32>
    %202 = vector.shape_cast %199 : vector<8x256xf32> to vector<1x8x256xf32>
    %203 = vector.broadcast %201 : vector<2x1x256xf32> to vector<2x8x256xf32>
    %204 = vector.broadcast %202 : vector<1x8x256xf32> to vector<2x8x256xf32>
    %205 = arith.mulf %203, %204 : vector<2x8x256xf32>
    %206 = arith.addf %197, %205 : vector<2x8x256xf32>
    %c0_105 = arith.constant 0 : index
    %c2_106 = arith.constant 2 : index
    %c1_107 = arith.constant 1 : index
    %c0_108 = arith.constant 0 : index
    %207 = vector.load %arg2[%c0_105, %c2_106, %c1_107, %c0_108] : memref<2x4x3x288xf32, #tpu.memory_space<vmem>>, vector<2x1x1x288xf32>
    %208 = vector.shape_cast %207 : vector<2x1x1x288xf32> to vector<2x288xf32>
    %c2_109 = arith.constant 2 : index
    %c1_110 = arith.constant 1 : index
    %c0_111 = arith.constant 0 : index
    %c0_112 = arith.constant 0 : index
    %209 = vector.load %arg3[%c2_109, %c1_110, %c0_111, %c0_112] : memref<4x9x8x256xf32, #tpu.memory_space<vmem>>, vector<1x1x8x256xf32>
    %210 = vector.shape_cast %209 : vector<1x1x8x256xf32> to vector<8x256xf32>
    %211 = vector.extract_strided_slice %208 {offsets = [0, 0], sizes = [2, 256], strides = [1, 1]} : vector<2x288xf32> to vector<2x256xf32>
    %212 = vector.shape_cast %211 : vector<2x256xf32> to vector<2x1x256xf32>
    %213 = vector.shape_cast %210 : vector<8x256xf32> to vector<1x8x256xf32>
    %214 = vector.broadcast %212 : vector<2x1x256xf32> to vector<2x8x256xf32>
    %215 = vector.broadcast %213 : vector<1x8x256xf32> to vector<2x8x256xf32>
    %216 = arith.mulf %214, %215 : vector<2x8x256xf32>
    %217 = arith.addf %206, %216 : vector<2x8x256xf32>
    %c2_113 = arith.constant 2 : index
    %c4_114 = arith.constant 4 : index
    %c0_115 = arith.constant 0 : index
    %c0_116 = arith.constant 0 : index
    %218 = vector.load %arg3[%c2_113, %c4_114, %c0_115, %c0_116] : memref<4x9x8x256xf32, #tpu.memory_space<vmem>>, vector<1x1x8x256xf32>
    %219 = vector.shape_cast %218 : vector<1x1x8x256xf32> to vector<8x256xf32>
    %220 = vector.extract_strided_slice %208 {offsets = [0, 16], sizes = [2, 256], strides = [1, 1]} : vector<2x288xf32> to vector<2x256xf32>
    %221 = vector.shape_cast %220 : vector<2x256xf32> to vector<2x1x256xf32>
    %222 = vector.shape_cast %219 : vector<8x256xf32> to vector<1x8x256xf32>
    %223 = vector.broadcast %221 : vector<2x1x256xf32> to vector<2x8x256xf32>
    %224 = vector.broadcast %222 : vector<1x8x256xf32> to vector<2x8x256xf32>
    %225 = arith.mulf %223, %224 : vector<2x8x256xf32>
    %226 = arith.addf %217, %225 : vector<2x8x256xf32>
    %c2_117 = arith.constant 2 : index
    %c7_118 = arith.constant 7 : index
    %c0_119 = arith.constant 0 : index
    %c0_120 = arith.constant 0 : index
    %227 = vector.load %arg3[%c2_117, %c7_118, %c0_119, %c0_120] : memref<4x9x8x256xf32, #tpu.memory_space<vmem>>, vector<1x1x8x256xf32>
    %228 = vector.shape_cast %227 : vector<1x1x8x256xf32> to vector<8x256xf32>
    %229 = vector.extract_strided_slice %208 {offsets = [0, 32], sizes = [2, 256], strides = [1, 1]} : vector<2x288xf32> to vector<2x256xf32>
    %230 = vector.shape_cast %229 : vector<2x256xf32> to vector<2x1x256xf32>
    %231 = vector.shape_cast %228 : vector<8x256xf32> to vector<1x8x256xf32>
    %232 = vector.broadcast %230 : vector<2x1x256xf32> to vector<2x8x256xf32>
    %233 = vector.broadcast %231 : vector<1x8x256xf32> to vector<2x8x256xf32>
    %234 = arith.mulf %232, %233 : vector<2x8x256xf32>
    %235 = arith.addf %226, %234 : vector<2x8x256xf32>
    %c0_121 = arith.constant 0 : index
    %c2_122 = arith.constant 2 : index
    %c2_123 = arith.constant 2 : index
    %c0_124 = arith.constant 0 : index
    %236 = vector.load %arg2[%c0_121, %c2_122, %c2_123, %c0_124] : memref<2x4x3x288xf32, #tpu.memory_space<vmem>>, vector<2x1x1x288xf32>
    %237 = vector.shape_cast %236 : vector<2x1x1x288xf32> to vector<2x288xf32>
    %c2_125 = arith.constant 2 : index
    %c2_126 = arith.constant 2 : index
    %c0_127 = arith.constant 0 : index
    %c0_128 = arith.constant 0 : index
    %238 = vector.load %arg3[%c2_125, %c2_126, %c0_127, %c0_128] : memref<4x9x8x256xf32, #tpu.memory_space<vmem>>, vector<1x1x8x256xf32>
    %239 = vector.shape_cast %238 : vector<1x1x8x256xf32> to vector<8x256xf32>
    %240 = vector.extract_strided_slice %237 {offsets = [0, 0], sizes = [2, 256], strides = [1, 1]} : vector<2x288xf32> to vector<2x256xf32>
    %241 = vector.shape_cast %240 : vector<2x256xf32> to vector<2x1x256xf32>
    %242 = vector.shape_cast %239 : vector<8x256xf32> to vector<1x8x256xf32>
    %243 = vector.broadcast %241 : vector<2x1x256xf32> to vector<2x8x256xf32>
    %244 = vector.broadcast %242 : vector<1x8x256xf32> to vector<2x8x256xf32>
    %245 = arith.mulf %243, %244 : vector<2x8x256xf32>
    %246 = arith.addf %235, %245 : vector<2x8x256xf32>
    %c2_129 = arith.constant 2 : index
    %c5_130 = arith.constant 5 : index
    %c0_131 = arith.constant 0 : index
    %c0_132 = arith.constant 0 : index
    %247 = vector.load %arg3[%c2_129, %c5_130, %c0_131, %c0_132] : memref<4x9x8x256xf32, #tpu.memory_space<vmem>>, vector<1x1x8x256xf32>
    %248 = vector.shape_cast %247 : vector<1x1x8x256xf32> to vector<8x256xf32>
    %249 = vector.extract_strided_slice %237 {offsets = [0, 16], sizes = [2, 256], strides = [1, 1]} : vector<2x288xf32> to vector<2x256xf32>
    %250 = vector.shape_cast %249 : vector<2x256xf32> to vector<2x1x256xf32>
    %251 = vector.shape_cast %248 : vector<8x256xf32> to vector<1x8x256xf32>
    %252 = vector.broadcast %250 : vector<2x1x256xf32> to vector<2x8x256xf32>
    %253 = vector.broadcast %251 : vector<1x8x256xf32> to vector<2x8x256xf32>
    %254 = arith.mulf %252, %253 : vector<2x8x256xf32>
    %255 = arith.addf %246, %254 : vector<2x8x256xf32>
    %c2_133 = arith.constant 2 : index
    %c8_134 = arith.constant 8 : index
    %c0_135 = arith.constant 0 : index
    %c0_136 = arith.constant 0 : index
    %256 = vector.load %arg3[%c2_133, %c8_134, %c0_135, %c0_136] : memref<4x9x8x256xf32, #tpu.memory_space<vmem>>, vector<1x1x8x256xf32>
    %257 = vector.shape_cast %256 : vector<1x1x8x256xf32> to vector<8x256xf32>
    %258 = vector.extract_strided_slice %237 {offsets = [0, 32], sizes = [2, 256], strides = [1, 1]} : vector<2x288xf32> to vector<2x256xf32>
    %259 = vector.shape_cast %258 : vector<2x256xf32> to vector<2x1x256xf32>
    %260 = vector.shape_cast %257 : vector<8x256xf32> to vector<1x8x256xf32>
    %261 = vector.broadcast %259 : vector<2x1x256xf32> to vector<2x8x256xf32>
    %262 = vector.broadcast %260 : vector<1x8x256xf32> to vector<2x8x256xf32>
    %263 = arith.mulf %261, %262 : vector<2x8x256xf32>
    %264 = arith.addf %255, %263 : vector<2x8x256xf32>
    %c0_137 = arith.constant 0 : index
    %c3_138 = arith.constant 3 : index
    %c0_139 = arith.constant 0 : index
    %c0_140 = arith.constant 0 : index
    %265 = vector.load %arg2[%c0_137, %c3_138, %c0_139, %c0_140] : memref<2x4x3x288xf32, #tpu.memory_space<vmem>>, vector<2x1x1x288xf32>
    %266 = vector.shape_cast %265 : vector<2x1x1x288xf32> to vector<2x288xf32>
    %c3_141 = arith.constant 3 : index
    %c0_142 = arith.constant 0 : index
    %c0_143 = arith.constant 0 : index
    %c0_144 = arith.constant 0 : index
    %267 = vector.load %arg3[%c3_141, %c0_142, %c0_143, %c0_144] : memref<4x9x8x256xf32, #tpu.memory_space<vmem>>, vector<1x1x8x256xf32>
    %268 = vector.shape_cast %267 : vector<1x1x8x256xf32> to vector<8x256xf32>
    %269 = vector.extract_strided_slice %266 {offsets = [0, 0], sizes = [2, 256], strides = [1, 1]} : vector<2x288xf32> to vector<2x256xf32>
    %270 = vector.shape_cast %269 : vector<2x256xf32> to vector<2x1x256xf32>
    %271 = vector.shape_cast %268 : vector<8x256xf32> to vector<1x8x256xf32>
    %272 = vector.broadcast %270 : vector<2x1x256xf32> to vector<2x8x256xf32>
    %273 = vector.broadcast %271 : vector<1x8x256xf32> to vector<2x8x256xf32>
    %274 = arith.mulf %272, %273 : vector<2x8x256xf32>
    %275 = arith.addf %264, %274 : vector<2x8x256xf32>
    %c3_145 = arith.constant 3 : index
    %c3_146 = arith.constant 3 : index
    %c0_147 = arith.constant 0 : index
    %c0_148 = arith.constant 0 : index
    %276 = vector.load %arg3[%c3_145, %c3_146, %c0_147, %c0_148] : memref<4x9x8x256xf32, #tpu.memory_space<vmem>>, vector<1x1x8x256xf32>
    %277 = vector.shape_cast %276 : vector<1x1x8x256xf32> to vector<8x256xf32>
    %278 = vector.extract_strided_slice %266 {offsets = [0, 16], sizes = [2, 256], strides = [1, 1]} : vector<2x288xf32> to vector<2x256xf32>
    %279 = vector.shape_cast %278 : vector<2x256xf32> to vector<2x1x256xf32>
    %280 = vector.shape_cast %277 : vector<8x256xf32> to vector<1x8x256xf32>
    %281 = vector.broadcast %279 : vector<2x1x256xf32> to vector<2x8x256xf32>
    %282 = vector.broadcast %280 : vector<1x8x256xf32> to vector<2x8x256xf32>
    %283 = arith.mulf %281, %282 : vector<2x8x256xf32>
    %284 = arith.addf %275, %283 : vector<2x8x256xf32>
    %c3_149 = arith.constant 3 : index
    %c6_150 = arith.constant 6 : index
    %c0_151 = arith.constant 0 : index
    %c0_152 = arith.constant 0 : index
    %285 = vector.load %arg3[%c3_149, %c6_150, %c0_151, %c0_152] : memref<4x9x8x256xf32, #tpu.memory_space<vmem>>, vector<1x1x8x256xf32>
    %286 = vector.shape_cast %285 : vector<1x1x8x256xf32> to vector<8x256xf32>
    %287 = vector.extract_strided_slice %266 {offsets = [0, 32], sizes = [2, 256], strides = [1, 1]} : vector<2x288xf32> to vector<2x256xf32>
    %288 = vector.shape_cast %287 : vector<2x256xf32> to vector<2x1x256xf32>
    %289 = vector.shape_cast %286 : vector<8x256xf32> to vector<1x8x256xf32>
    %290 = vector.broadcast %288 : vector<2x1x256xf32> to vector<2x8x256xf32>
    %291 = vector.broadcast %289 : vector<1x8x256xf32> to vector<2x8x256xf32>
    %292 = arith.mulf %290, %291 : vector<2x8x256xf32>
    %293 = arith.addf %284, %292 : vector<2x8x256xf32>
    %c0_153 = arith.constant 0 : index
    %c3_154 = arith.constant 3 : index
    %c1_155 = arith.constant 1 : index
    %c0_156 = arith.constant 0 : index
    %294 = vector.load %arg2[%c0_153, %c3_154, %c1_155, %c0_156] : memref<2x4x3x288xf32, #tpu.memory_space<vmem>>, vector<2x1x1x288xf32>
    %295 = vector.shape_cast %294 : vector<2x1x1x288xf32> to vector<2x288xf32>
    %c3_157 = arith.constant 3 : index
    %c1_158 = arith.constant 1 : index
    %c0_159 = arith.constant 0 : index
    %c0_160 = arith.constant 0 : index
    %296 = vector.load %arg3[%c3_157, %c1_158, %c0_159, %c0_160] : memref<4x9x8x256xf32, #tpu.memory_space<vmem>>, vector<1x1x8x256xf32>
    %297 = vector.shape_cast %296 : vector<1x1x8x256xf32> to vector<8x256xf32>
    %298 = vector.extract_strided_slice %295 {offsets = [0, 0], sizes = [2, 256], strides = [1, 1]} : vector<2x288xf32> to vector<2x256xf32>
    %299 = vector.shape_cast %298 : vector<2x256xf32> to vector<2x1x256xf32>
    %300 = vector.shape_cast %297 : vector<8x256xf32> to vector<1x8x256xf32>
    %301 = vector.broadcast %299 : vector<2x1x256xf32> to vector<2x8x256xf32>
    %302 = vector.broadcast %300 : vector<1x8x256xf32> to vector<2x8x256xf32>
    %303 = arith.mulf %301, %302 : vector<2x8x256xf32>
    %304 = arith.addf %293, %303 : vector<2x8x256xf32>
    %c3_161 = arith.constant 3 : index
    %c4_162 = arith.constant 4 : index
    %c0_163 = arith.constant 0 : index
    %c0_164 = arith.constant 0 : index
    %305 = vector.load %arg3[%c3_161, %c4_162, %c0_163, %c0_164] : memref<4x9x8x256xf32, #tpu.memory_space<vmem>>, vector<1x1x8x256xf32>
    %306 = vector.shape_cast %305 : vector<1x1x8x256xf32> to vector<8x256xf32>
    %307 = vector.extract_strided_slice %295 {offsets = [0, 16], sizes = [2, 256], strides = [1, 1]} : vector<2x288xf32> to vector<2x256xf32>
    %308 = vector.shape_cast %307 : vector<2x256xf32> to vector<2x1x256xf32>
    %309 = vector.shape_cast %306 : vector<8x256xf32> to vector<1x8x256xf32>
    %310 = vector.broadcast %308 : vector<2x1x256xf32> to vector<2x8x256xf32>
    %311 = vector.broadcast %309 : vector<1x8x256xf32> to vector<2x8x256xf32>
    %312 = arith.mulf %310, %311 : vector<2x8x256xf32>
    %313 = arith.addf %304, %312 : vector<2x8x256xf32>
    %c3_165 = arith.constant 3 : index
    %c7_166 = arith.constant 7 : index
    %c0_167 = arith.constant 0 : index
    %c0_168 = arith.constant 0 : index
    %314 = vector.load %arg3[%c3_165, %c7_166, %c0_167, %c0_168] : memref<4x9x8x256xf32, #tpu.memory_space<vmem>>, vector<1x1x8x256xf32>
    %315 = vector.shape_cast %314 : vector<1x1x8x256xf32> to vector<8x256xf32>
    %316 = vector.extract_strided_slice %295 {offsets = [0, 32], sizes = [2, 256], strides = [1, 1]} : vector<2x288xf32> to vector<2x256xf32>
    %317 = vector.shape_cast %316 : vector<2x256xf32> to vector<2x1x256xf32>
    %318 = vector.shape_cast %315 : vector<8x256xf32> to vector<1x8x256xf32>
    %319 = vector.broadcast %317 : vector<2x1x256xf32> to vector<2x8x256xf32>
    %320 = vector.broadcast %318 : vector<1x8x256xf32> to vector<2x8x256xf32>
    %321 = arith.mulf %319, %320 : vector<2x8x256xf32>
    %322 = arith.addf %313, %321 : vector<2x8x256xf32>
    %c0_169 = arith.constant 0 : index
    %c3_170 = arith.constant 3 : index
    %c2_171 = arith.constant 2 : index
    %c0_172 = arith.constant 0 : index
    %323 = vector.load %arg2[%c0_169, %c3_170, %c2_171, %c0_172] : memref<2x4x3x288xf32, #tpu.memory_space<vmem>>, vector<2x1x1x288xf32>
    %324 = vector.shape_cast %323 : vector<2x1x1x288xf32> to vector<2x288xf32>
    %c3_173 = arith.constant 3 : index
    %c2_174 = arith.constant 2 : index
    %c0_175 = arith.constant 0 : index
    %c0_176 = arith.constant 0 : index
    %325 = vector.load %arg3[%c3_173, %c2_174, %c0_175, %c0_176] : memref<4x9x8x256xf32, #tpu.memory_space<vmem>>, vector<1x1x8x256xf32>
    %326 = vector.shape_cast %325 : vector<1x1x8x256xf32> to vector<8x256xf32>
    %327 = vector.extract_strided_slice %324 {offsets = [0, 0], sizes = [2, 256], strides = [1, 1]} : vector<2x288xf32> to vector<2x256xf32>
    %328 = vector.shape_cast %327 : vector<2x256xf32> to vector<2x1x256xf32>
    %329 = vector.shape_cast %326 : vector<8x256xf32> to vector<1x8x256xf32>
    %330 = vector.broadcast %328 : vector<2x1x256xf32> to vector<2x8x256xf32>
    %331 = vector.broadcast %329 : vector<1x8x256xf32> to vector<2x8x256xf32>
    %332 = arith.mulf %330, %331 : vector<2x8x256xf32>
    %333 = arith.addf %322, %332 : vector<2x8x256xf32>
    %c3_177 = arith.constant 3 : index
    %c5_178 = arith.constant 5 : index
    %c0_179 = arith.constant 0 : index
    %c0_180 = arith.constant 0 : index
    %334 = vector.load %arg3[%c3_177, %c5_178, %c0_179, %c0_180] : memref<4x9x8x256xf32, #tpu.memory_space<vmem>>, vector<1x1x8x256xf32>
    %335 = vector.shape_cast %334 : vector<1x1x8x256xf32> to vector<8x256xf32>
    %336 = vector.extract_strided_slice %324 {offsets = [0, 16], sizes = [2, 256], strides = [1, 1]} : vector<2x288xf32> to vector<2x256xf32>
    %337 = vector.shape_cast %336 : vector<2x256xf32> to vector<2x1x256xf32>
    %338 = vector.shape_cast %335 : vector<8x256xf32> to vector<1x8x256xf32>
    %339 = vector.broadcast %337 : vector<2x1x256xf32> to vector<2x8x256xf32>
    %340 = vector.broadcast %338 : vector<1x8x256xf32> to vector<2x8x256xf32>
    %341 = arith.mulf %339, %340 : vector<2x8x256xf32>
    %342 = arith.addf %333, %341 : vector<2x8x256xf32>
    %c3_181 = arith.constant 3 : index
    %c8_182 = arith.constant 8 : index
    %c0_183 = arith.constant 0 : index
    %c0_184 = arith.constant 0 : index
    %343 = vector.load %arg3[%c3_181, %c8_182, %c0_183, %c0_184] : memref<4x9x8x256xf32, #tpu.memory_space<vmem>>, vector<1x1x8x256xf32>
    %344 = vector.shape_cast %343 : vector<1x1x8x256xf32> to vector<8x256xf32>
    %345 = vector.extract_strided_slice %324 {offsets = [0, 32], sizes = [2, 256], strides = [1, 1]} : vector<2x288xf32> to vector<2x256xf32>
    %346 = vector.shape_cast %345 : vector<2x256xf32> to vector<2x1x256xf32>
    %347 = vector.shape_cast %344 : vector<8x256xf32> to vector<1x8x256xf32>
    %348 = vector.broadcast %346 : vector<2x1x256xf32> to vector<2x8x256xf32>
    %349 = vector.broadcast %347 : vector<1x8x256xf32> to vector<2x8x256xf32>
    %350 = arith.mulf %348, %349 : vector<2x8x256xf32>
    %351 = arith.addf %342, %350 : vector<2x8x256xf32>
    %c0_185 = arith.constant 0 : index
    %c0_186 = arith.constant 0 : index
    %c0_187 = arith.constant 0 : index
    %352 = vector.load %arg5[%c0_185, %c0_186, %c0_187] : memref<2x8x256xf32, #tpu.memory_space<vmem>>, vector<2x8x256xf32>
    tpu.vector_store %arg5[%c0_185, %c0_186, %c0_187], %351 {strides = array<i32>} : memref<2x8x256xf32, #tpu.memory_space<vmem>>, vector<2x8x256xf32>,
    return
  }
  func.func @transform_0(%arg0: i32, %arg1: i32) -> (i32, i32, i32, i32) {
    %c1_i32 = arith.constant 1 : i32
    %0 = arith.muli %arg0, %c1_i32 : i32
    %1 = arith.addi %0, %arg1 : i32
    %c0_i32 = arith.constant 0 : i32
    %c0_i32_0 = arith.constant 0 : i32
    %c0_i32_1 = arith.constant 0 : i32
    %c0_i32_2 = arith.constant 0 : i32
    return %1, %c0_i32, %c0_i32_0, %c0_i32_1 : i32, i32, i32, i32
  }
  func.func @transform_1(%arg0: i32, %arg1: i32) -> (i32, i32, i32, i32) {
    %c0_i32 = arith.constant 0 : i32
    %c0_i32_0 = arith.constant 0 : i32
    %c0_i32_1 = arith.constant 0 : i32
    %c0_i32_2 = arith.constant 0 : i32
    return %c0_i32, %c0_i32_0, %c0_i32_1, %arg0 : i32, i32, i32, i32
  }
  func.func @transform_2(%arg0: i32, %arg1: i32) -> (i32, i32) {
    %c0_i32 = arith.constant 0 : i32
    %c0_i32_0 = arith.constant 0 : i32
    return %c0_i32, %arg0 : i32, i32
  }
  func.func @transform_3(%arg0: i32, %arg1: i32) -> (i32, i32, i32) {
    %c0_i32 = arith.constant 0 : i32
    %c0_i32_0 = arith.constant 0 : i32
    return %arg1, %c0_i32, %arg0 : i32, i32, i32
  }
}

</mosaic_0001>

<bundles_post_ra>
// kernel: locally_connected_2d.1
= control target key start
LH: loop header
LB: loop body
LE: loop exit
PB: predicated region body
PF: predicated region fallthrough
CT: control target
= control target key end

     0   :  { %s1909_s14 = smov 16   ;;  %s1910_s19 = smov 32   ;;  %v48_v16 = vlaneseq  ;;  %vm95_vm0 = vcmask 130048   ;;  %vm146_vm1 = vcmask 261120   ;;  %vm124_vm2 = vcmask 916480   ;;  %s3230_s1 = inlined_call_operand.vmem [shape: f32[4,9,8,256], index: 1, kind: input, shape index: {}]   ;;  %s3231_s0 = inlined_call_operand.vmem [shape: f32[2,4,3,288], index: 0, kind: input, shape index: {}]   ;;  %s3232_s2 = inlined_call_operand.vmem [shape: f32[8,256], index: 2, kind: input, shape index: {}]   ;;  %s3233_s3 = inlined_call_operand.vmem [shape: f32[2,8,256], index: 3, kind: output, shape index: {}]  }
   0x1   :  { %v1813_v0 = vld [vmem:[%s3230_s1 + $0x30] sm:$0xff]  ;;  %v1816_v1 = vld [vmem:[%s3230_s1 + $0x68] sm:$0xff]  ;;  %v1814_v2 = vld [vmem:[%s3230_s1 + $0x38] sm:$0xff]  ;;  %s1911_s25 = smov 112   ;;  %s1912_s28 = smov 96   ;;  %vm175_vm3 = vcmask 785408  }
   0x2   :  { %91 = vrot.lane.b32.xlu0 %v1813_v0, %s1909_s14  ;;  %144 = vrot.lane.b32.xlu1 %v1816_v1, %s1910_s19  ;;  %v1822_v3 = vld [vmem:[%s3230_s1 + $0x48] sm:$0xff]  ;;  %v1815_v4 = vld [vmem:[%s3230_s1 + $0x60] sm:$0xff]  ;;  %v1997_v17 = vshrl.u32 %v48_v16, 7 }
   0x3   :  { %v1824_v5 = vld [vmem:[%s3230_s1 + $0x78] sm:$0xff]  ;;  %v1821_v6 = vld [vmem:[%s3230_s1 + $0x40] sm:$0xff]  ;;  %v1823_v8 = vld [vmem:[%s3230_s1 + $0x70] sm:$0xff] }
   0x4   :  { %v1830_v7 = vld [vmem:[%s3230_s1 + $0x58] sm:$0xff]  ;;  %v1832_v9 = vld [vmem:[%s3230_s1 + $0x88] sm:$0xff]  ;;  %v1829_v10 = vld [vmem:[%s3230_s1 + $0x50] sm:$0xff]  ;;  %v2000_v18 = vsub.s32 0, %v1997_v17  ;;  %v2012_v21 = vsub.s32 2, %v1997_v17 }
   0x5   :  { %v1838_v11 = vld [vmem:[%s3230_s1 + $0xc8] sm:$0xff]  ;;  %v1831_v12 = vld [vmem:[%s3230_s1 + $0x80] sm:$0xff]  ;;  %v1840_v13 = vld [vmem:[%s3230_s1 + $0xf8] sm:$0xff] }
   0x6   :  { %93 = vrot.lane.b32.xlu0 %v1814_v2, %s1909_s14  ;;  %242 = vrot.lane.b32.xlu1 %v1822_v3, %s1909_s14  ;;  %v1837_v14 = vld [vmem:[%s3230_s1 + $0xc0] sm:$0xff]  ;;  %v1839_v15 = vld [vmem:[%s3230_s1 + $0xf0] sm:$0xff] }
   0x7   :  { %v2005_v19 = vld [vmem:[%s3231_s0] ss:$4 sm:$0x7]  ;;  %v2017_v22 = vld [vmem:[%s3231_s0 + $0x30] ss:$4 sm:$0x7] }
   0x8   :  { %v2009_v20 = vrot.slane %v2005_v19, %v2000_v18  ;;  %v82_v25 = vrot.slane %v2005_v19, %v2012_v21  ;;  %v2027_v26 = vrot.slane %v2017_v22, %v2000_v18  ;;  %v86_v27 = vrot.slane %v2017_v22, %v2012_v21  ;;  %v2047_v34 = vld [vmem:[%s3231_s0 + $0x1] ss:$4 sm:$0x7]  ;;  %v2065_v40 = vld [vmem:[%s3231_s0 + $0x31] ss:$4 sm:$0x7] }
   0x9   :  { %v2058_v38 = vrot.slane %v2047_v34, %v2000_v18  ;;  %v231_v41 = vrot.slane %v2047_v34, %v2012_v21  ;;  %v2076_v44 = vrot.slane %v2065_v40, %v2000_v18  ;;  %v235_v48 = vrot.slane %v2065_v40, %v2012_v21  ;;  %v2099_v53 = vld [vmem:[%s3231_s0 + $0x2] ss:$4 sm:$0x7]  ;;  %v2115_v58 = vld [vmem:[%s3231_s0 + $0x32] ss:$4 sm:$0x7] }
   0xa   :  { %142 = vrot.lane.b32.xlu0 %v1815_v4, %s1910_s19  ;;  %291 = vrot.lane.b32.xlu1 %v1824_v5, %s1910_s19  ;;  %v2108_v56 = vrot.slane %v2099_v53, %v2000_v18  ;;  %v376_v59 = vrot.slane %v2099_v53, %v2012_v21  ;;  %v2126_v62 = vrot.slane %v2115_v58, %v2000_v18 }
   0xb   :  { %v380_v2 = vrot.slane %v2115_v58, %v2012_v21 }
   0xe   :  { %240 = vrot.lane.b32.xlu0 %v1821_v6, %s1909_s14  ;;  %387 = vrot.lane.b32.xlu1 %v1830_v7, %s1909_s14  ;;  %v2149_v7 = vld [vmem:[%s3231_s0 + $0xc] ss:$4 sm:$0x7] }
  0x12   :  { %289 = vrot.lane.b32.xlu0 %v1823_v8, %s1910_s19  ;;  %436 = vrot.lane.b32.xlu1 %v1832_v9, %s1910_s19 }
  0x16   :  { %385 = vrot.lane.b32.xlu0 %v1829_v10, %s1909_s14  ;;  %532 = vrot.lane.b32.xlu1 %v1838_v11, %s1909_s14  ;;  %v2158_v10 = vrot.slane %v2149_v7, %v2000_v18 }
  0x1a   :  { %434 = vrot.lane.b32.xlu0 %v1831_v12, %s1910_s19  ;;  %581 = vrot.lane.b32.xlu1 %v1840_v13, %s1910_s19  ;;  %v1834_v12 = vld [vmem:[%s3231_s0 + $0x3c] ss:$4 sm:$0x7]  ;;  %v521_v13 = vrot.slane %v2149_v7, %v2012_v21 }
  0x1b   :  { %v2173_v16 = vrot.slane %v1834_v12, %v2000_v18 }
  0x1e   :  { %530 = vrot.lane.b32.xlu0 %v1837_v14, %s1909_s14 }
  0x22   :  { %579 = vrot.lane.b32.xlu0 %v1839_v15, %s1910_s19 }
  0x74   :  { %v2019_v23 = vpop.permute.xlu0 %91  ;;  %v2042_v33 = vpop.permute.xlu1 %144 }
  0x75   :  { %v100_v24 = vmul.f32 %v2019_v23, %v2009_v20  ;;  %v103_v30 = vmul.f32 %v2019_v23, %v2027_v26  ;;  %v153_v36 = vmul.f32 %v2042_v33, %v82_v25  ;;  %v156_v43 = vmul.f32 %v2042_v33, %v86_v27 }
  0x77   :  { %112 = vrot.lane.b32.xlu1 %v100_v24, %s1911_s25 }
  0x78   :  { %v2032_v28 = vpop.permute.xlu0 %93  ;;  %v2078_v45 = vpop.permute.xlu1 %242 }
  0x79   :  { %v102_v29 = vmul.f32 %v2032_v28, %v82_v25  ;;  %v105_v31 = vmul.f32 %v2032_v28, %v86_v27  ;;  %v250_v46 = vmul.f32 %v2078_v45, %v231_v41  ;;  %v253_v51 = vmul.f32 %v2078_v45, %v235_v48 }
  0x7b   :  { %116 = vrot.lane.b32.xlu0 %v102_v29, %s1911_s25  ;;  %118 = vrot.lane.b32.xlu1 %v103_v30, %s1911_s25  ;;  %v2180_v29 = vrot.slane %v1834_v12, %v2012_v21 }
  0x7c   :  { %v2040_v32 = vpop.permute.xlu0 %142  ;;  %v2094_v52 = vpop.permute.xlu1 %291 }
  0x7d   :  { %v151_v35 = vmul.f32 %v2040_v32, %v2009_v20  ;;  %v154_v37 = vmul.f32 %v2040_v32, %v2027_v26  ;;  %v299_v54 = vmul.f32 %v2094_v52, %v231_v41  ;;  %v302_v61 = vmul.f32 %v2094_v52, %v235_v48 }
  0x7f   :  { %163 = vrot.lane.b32.xlu0 %v151_v35, %s1912_s28  ;;  %122 = vrot.lane.b32.xlu1 %v105_v31, %s1911_s25 }
  0x80   :  { %v2060_v39 = vpop.permute.xlu0 %240  ;;  %v2128_v63 = vpop.permute.xlu1 %387 }
  0x81   :  { %v248_v42 = vmul.f32 %v2060_v39, %v2058_v38  ;;  %v251_v47 = vmul.f32 %v2060_v39, %v2076_v44  ;;  %v395_v0 = vmul.f32 %v2128_v63, %v376_v59  ;;  %v398_v5 = vmul.f32 %v2128_v63, %v380_v2 }
  0x83   :  { %167 = vrot.lane.b32.xlu0 %v153_v36, %s1912_s28  ;;  %169 = vrot.lane.b32.xlu1 %v154_v37, %s1912_s28  ;;  %v2187_v37 = vsub.s32 1, %v1997_v17  ;;  %v96_v17 = vsel %vm95_vm0, %v2019_v23, %v2032_v28 }
  0x84   :  { %v2087_v49 = vpop.permute.xlu0 %289  ;;  %v2144_v6 = vpop.permute.xlu1 %436 }
  0x85   :  { %v297_v50 = vmul.f32 %v2087_v49, %v2058_v38  ;;  %v300_v55 = vmul.f32 %v2087_v49, %v2076_v44  ;;  %v444_v8 = vmul.f32 %v2144_v6, %v376_v59  ;;  %v447_v15 = vmul.f32 %v2144_v6, %v380_v2 }
  0x86   :  { %v2216_v28 = vrot.slane %v2065_v40, %v2187_v37  ;;  %v293_v40 = vsel %vm146_vm1, %v2087_v49, %v2094_v52  ;;  %v2259_v59 = vrot.slane %v1834_v12, %v2187_v37 }
  0x87   :  { %260 = vrot.lane.b32.xlu0 %v248_v42, %s1911_s25  ;;  %173 = vrot.lane.b32.xlu1 %v156_v43, %s1912_s28  ;;  %v2194_v43 = vrot.slane %v2017_v22, %v2187_v37  ;;  %v147_v22 = vsel %vm146_vm1, %v2040_v32, %v2042_v33  ;;  %v244_v32 = vsel %vm95_vm0, %v2060_v39, %v2078_v45 }
  0x88   :  { %v2110_v57 = vpop.permute.xlu0 %385  ;;  %v533_v24 = vpop.permute.xlu1 %532  ;;  %v252_v33 = vmul.f32 %v244_v32, %v2216_v28  ;;  %v2238_v45 = vrot.slane %v2115_v58, %v2187_v37 }
  0x89   :  { %v393_v60 = vmul.f32 %v2110_v57, %v2108_v56  ;;  %v396_v1 = vmul.f32 %v2110_v57, %v2126_v62  ;;  %v540_v25 = vmul.f32 %v533_v24, %v521_v13  ;;  %v543_v35 = vmul.f32 %v533_v24, %v2180_v29 }
  0x8a   :  { %v389_v49 = vsel %vm95_vm0, %v2110_v57, %v2128_v63 }
  0x8b   :  { %264 = vrot.lane.b32.xlu0 %v250_v46, %s1911_s25  ;;  %266 = vrot.lane.b32.xlu1 %v251_v47, %s1911_s25  ;;  %v2198_v46 = vrot.slane %v2005_v19, %v2187_v37  ;;  %v104_v47 = vmul.f32 %v96_v17, %v2194_v43  ;;  %v155_v19 = vmul.f32 %v147_v22, %v2194_v43 }
  0x8c   :  { %v2137_v3 = vpop.permute.xlu0 %434  ;;  %v582_v36 = vpop.permute.xlu1 %581  ;;  %v397_v52 = vmul.f32 %v389_v49, %v2238_v45 }
  0x8d   :  { %v442_v4 = vmul.f32 %v2137_v3, %v2108_v56  ;;  %v445_v9 = vmul.f32 %v2137_v3, %v2126_v62  ;;  %v589_v41 = vmul.f32 %v582_v36, %v521_v13  ;;  %v101_v48 = vmul.f32 %v96_v17, %v2198_v46 }
  0x8e   :  { %v152_v23 = vmul.f32 %v147_v22, %v2198_v46  ;;  %v438_v58 = vsel %vm146_vm1, %v2137_v3, %v2144_v6  ;;  %v1846_v6 = vld [vmem:[%s3230_s1 + $0xd8] sm:$0xff] }
  0x8f   :  { %309 = vrot.lane.b32.xlu0 %v297_v50, %s1912_s28  ;;  %270 = vrot.lane.b32.xlu1 %v253_v51, %s1911_s25  ;;  %v2220_v50 = vrot.slane %v2047_v34, %v2187_v37  ;;  %v301_v34 = vmul.f32 %v293_v40, %v2216_v28 }
  0x90   :  { %v2160_v11 = vpop.permute.xlu0 %530 }
  0x91   :  { %v538_v14 = vmul.f32 %v2160_v11, %v2158_v10  ;;  %v541_v27 = vmul.f32 %v2160_v11, %v2173_v16  ;;  %v249_v51 = vmul.f32 %v244_v32, %v2220_v50  ;;  %v298_v39 = vmul.f32 %v293_v40, %v2220_v50 }
  0x93   :  { %313 = vrot.lane.b32.xlu0 %v299_v54, %s1912_s28  ;;  %315 = vrot.lane.b32.xlu1 %v300_v55, %s1912_s28  ;;  %v2242_v54 = vrot.slane %v2099_v53, %v2187_v37  ;;  %v446_v53 = vmul.f32 %v438_v58, %v2238_v45 }
  0x94   :  { %v580_v30 = vpop.permute.xlu0 %579 }
  0x95   :  { %v587_v31 = vmul.f32 %v580_v30, %v2158_v10  ;;  %v590_v42 = vmul.f32 %v580_v30, %v2173_v16  ;;  %v394_v55 = vmul.f32 %v389_v49, %v2242_v54  ;;  %v443_v57 = vmul.f32 %v438_v58, %v2242_v54  ;;  %v45_v49 = vld [vmem:[%s3230_s1 + $0x8] sm:$0xff] }
  0x97   :  { %405 = vrot.lane.b32.xlu0 %v393_v60, %s1911_s25  ;;  %319 = vrot.lane.b32.xlu1 %v302_v61, %s1912_s28  ;;  %v2263_v60 = vrot.slane %v2149_v7, %v2187_v37  ;;  %v534_v61 = vsel %vm95_vm0, %v2160_v11, %v533_v24 }
  0x98   :  { %v542_v63 = vmul.f32 %v534_v61, %v2259_v59 }
  0x9b   :  { %409 = vrot.lane.b32.xlu0 %v395_v0, %s1911_s25  ;;  %411 = vrot.lane.b32.xlu1 %v396_v1, %s1911_s25  ;;  %v539_v0 = vmul.f32 %v534_v61, %v2263_v60  ;;  %v583_v1 = vsel %vm146_vm1, %v580_v30, %v582_v36 }
  0x9c   :  { %v591_v2 = vmul.f32 %v583_v1, %v2259_v59  ;;  %v588_v3 = vmul.f32 %v583_v1, %v2263_v60 }
  0x9f   :  { %454 = vrot.lane.b32.xlu0 %v442_v4, %s1912_s28  ;;  %415 = vrot.lane.b32.xlu1 %v398_v5, %s1911_s25  ;;  %v1845_v4 = vld [vmem:[%s3230_s1 + $0xd0] sm:$0xff]  ;;  %v592_v5 = vmul.f32 %v582_v36, %v2180_v29 }
  0xa3   :  { %458 = vrot.lane.b32.xlu0 %v444_v8, %s1912_s28  ;;  %460 = vrot.lane.b32.xlu1 %v445_v9, %s1912_s28 }
  0xa7   :  { %550 = vrot.lane.b32.xlu0 %v538_v14, %s1911_s25  ;;  %464 = vrot.lane.b32.xlu1 %v447_v15, %s1912_s28 }
  0xab   :  { %554 = vrot.lane.b32.xlu0 %v540_v25, %s1911_s25  ;;  %556 = vrot.lane.b32.xlu1 %v541_v27, %s1911_s25 }
  0xaf   :  { %599 = vrot.lane.b32.xlu0 %v587_v31, %s1912_s28  ;;  %560 = vrot.lane.b32.xlu1 %v543_v35, %s1911_s25 }
  0xb3   :  { %603 = vrot.lane.b32.xlu0 %v589_v41, %s1912_s28  ;;  %605 = vrot.lane.b32.xlu1 %v590_v42, %s1912_s28 }
  0xb7   :  { %120 = vrot.lane.b32.xlu0 %v104_v47, %s1911_s25  ;;  %114 = vrot.lane.b32.xlu1 %v101_v48, %s1911_s25 }
  0xbb   :  { %171 = vrot.lane.b32.xlu0 %v155_v19, %s1912_s28  ;;  %165 = vrot.lane.b32.xlu1 %v152_v23, %s1912_s28 }
  0xbf   :  { %268 = vrot.lane.b32.xlu0 %v252_v33, %s1911_s25  ;;  %262 = vrot.lane.b32.xlu1 %v249_v51, %s1911_s25 }
  0xc3   :  { %317 = vrot.lane.b32.xlu0 %v301_v34, %s1912_s28  ;;  %311 = vrot.lane.b32.xlu1 %v298_v39, %s1912_s28  ;;  %v44_v39 = vld [vmem:[%s3230_s1] sm:$0xff] }
  0xc4   :  { %v70_v58 = vmul.f32 %v2027_v26, %v44_v39  ;;  %v68_v61 = vmul.f32 %v2009_v20, %v44_v39  ;;  %v1820_v20 = vld [vmem:[%s3230_s1 + $0x18] sm:$0xff] }
  0xc7   :  { %413 = vrot.lane.b32.xlu0 %v397_v52, %s1911_s25  ;;  %407 = vrot.lane.b32.xlu1 %v394_v55, %s1911_s25 }
  0xcb   :  { %462 = vrot.lane.b32.xlu0 %v446_v53, %s1912_s28  ;;  %456 = vrot.lane.b32.xlu1 %v443_v57, %s1912_s28  ;;  %v71_v53 = vmul.f32 %v2194_v43, %v45_v49  ;;  %v69_v57 = vmul.f32 %v2198_v46, %v45_v49  ;;  %v1819_v43 = vld [vmem:[%s3230_s1 + $0x10] sm:$0xff] }
  0xcf   :  { %558 = vrot.lane.b32.xlu0 %v542_v63, %s1911_s25  ;;  %552 = vrot.lane.b32.xlu1 %v539_v0, %s1911_s25  ;;  %v39_v63 = vld [vmem:[%s3232_s2] sm:$0xff]  ;;  %v40_v0 = vld [vmem:[%s3232_s2 + $0x8] sm:$0xff] }
  0xd0   :  { %v74_v1 = vadd.f32 %v70_v58, %v39_v63  ;;  %v219_v58 = vmul.f32 %v1819_v43, %v2076_v44 }
  0xd3   :  { %607 = vrot.lane.b32.xlu0 %v591_v2, %s1912_s28  ;;  %601 = vrot.lane.b32.xlu1 %v588_v3, %s1912_s28  ;;  %v75_v2 = vadd.f32 %v71_v53, %v40_v0  ;;  %v220_v53 = vmul.f32 %v1820_v20, %v2216_v28 }
  0xd7   :  { %675 = vrot.lane.b32.xlu0 %v1845_v4, %s1909_s14  ;;  %609 = vrot.lane.b32.xlu1 %v592_v5, %s1912_s28  ;;  %v73_v4 = vadd.f32 %v69_v57, %v40_v0  ;;  %v72_v5 = vadd.f32 %v68_v61, %v39_v63  ;;  %v217_v57 = vmul.f32 %v1819_v43, %v2058_v38 }
  0xd8   :  { %v218_v61 = vmul.f32 %v1820_v20, %v2220_v50 }
  0xdb   :  { %677 = vrot.lane.b32.xlu1 %v1846_v6, %s1909_s14 }
  0xe9   :  { %v113_v7 = vpop.permute.xlu1 %112 }
  0xed   :  { %v117_v8 = vpop.permute.xlu0 %116  ;;  %v119_v9 = vpop.permute.xlu1 %118 }
  0xf1   :  { %v2288_v11 = vpop.permute.xlu0 %163  ;;  %v123_v12 = vpop.permute.xlu1 %122 }
  0xf5   :  { %v2290_v13 = vpop.permute.xlu0 %167  ;;  %v170_v14 = vpop.permute.xlu1 %169 }
  0xf9   :  { %v2292_v15 = vpop.permute.xlu0 %260  ;;  %v174_v24 = vpop.permute.xlu1 %173 }
  0xfd   :  { %v2294_v25 = vpop.permute.xlu0 %264  ;;  %v2296_v27 = vpop.permute.xlu1 %266 }
 0x101   :  { %v2298_v29 = vpop.permute.xlu0 %309  ;;  %v2300_v30 = vpop.permute.xlu1 %270 }
 0x105   :  { %v2302_v31 = vpop.permute.xlu0 %313  ;;  %v2304_v35 = vpop.permute.xlu1 %315 }
 0x109   :  { %v2306_v36 = vpop.permute.xlu0 %405  ;;  %v2308_v41 = vpop.permute.xlu1 %319 }
 0x10d   :  { %v2310_v42 = vpop.permute.xlu0 %409  ;;  %v2312_v17 = vpop.permute.xlu1 %411 }
 0x111   :  { %v2314_v47 = vpop.permute.xlu0 %454  ;;  %v2316_v48 = vpop.permute.xlu1 %415 }
 0x115   :  { %v2318_v22 = vpop.permute.xlu0 %458  ;;  %v2320_v19 = vpop.permute.xlu1 %460 }
 0x119   :  { %v2322_v23 = vpop.permute.xlu0 %550  ;;  %v2324_v32 = vpop.permute.xlu1 %464 }
 0x11d   :  { %v2326_v33 = vpop.permute.xlu0 %554  ;;  %v2328_v51 = vpop.permute.xlu1 %556 }
 0x11e   :  { %3234 = vst [vmem:[#allocation2_spill] sm:$0xff] %v2326_v33 }
 0x121   :  { %v2330_v40 = vpop.permute.xlu0 %599  ;;  %v2332_v34 = vpop.permute.xlu1 %560 }
 0x122   :  { %3235 = vst [vmem:[#allocation3_spill] sm:$0xff] %v2330_v40 }
 0x125   :  { %v2340_v52 = vpop.permute.xlu0 %603  ;;  %v2342_v55 = vpop.permute.xlu1 %605 }
 0x126   :  { %3236 = vst [vmem:[#allocation4_spill] sm:$0xff] %v2340_v52 }
 0x129   :  { %v121_v3 = vpop.permute.xlu0 %120  ;;  %v115_v26 = vpop.permute.xlu1 %114 }
 0x12a   :  { %v127_v46 = vsel %vm124_vm2, %v119_v9, %v121_v3  ;;  %v128_v6 = vsel %vm124_vm2, %v121_v3, %v123_v12  ;;  %v125_v39 = vsel %vm124_vm2, %v113_v7, %v115_v26  ;;  %v126_v49 = vsel %vm124_vm2, %v115_v26, %v117_v8 }
 0x12b   :  { %v135_v63 = vadd.f32 %v127_v46, %v74_v1  ;;  %v136_v0 = vadd.f32 %v128_v6, %v75_v2  ;;  %v133_v52 = vadd.f32 %v125_v39, %v72_v5  ;;  %v134_v40 = vadd.f32 %v126_v49, %v73_v4 }
 0x12d   :  { %v172_v9 = vpop.permute.xlu0 %171  ;;  %v166_v33 = vpop.permute.xlu1 %165 }
 0x12e   :  { %v178_v12 = vsel %vm175_vm3, %v170_v14, %v172_v9  ;;  %v179_v7 = vsel %vm175_vm3, %v172_v9, %v174_v24  ;;  %v176_v8 = vsel %vm175_vm3, %v2288_v11, %v166_v33  ;;  %v177_v44 = vsel %vm175_vm3, %v166_v33, %v2290_v13  ;;  %v1827_v14 = vld [vmem:[%s3230_s1 + $0x20] sm:$0xff]  ;;  %v1828_v11 = vld [vmem:[%s3230_s1 + $0x28] sm:$0xff] }
 0x12f   :  { %v186_v28 = vadd.f32 %v178_v12, %v135_v63  ;;  %v187_v38 = vadd.f32 %v179_v7, %v136_v0  ;;  %v184_v3 = vadd.f32 %v176_v8, %v133_v52  ;;  %v185_v50 = vadd.f32 %v177_v44, %v134_v40 }
 0x130   :  { %v364_v52 = vmul.f32 %v1827_v14, %v2126_v62  ;;  %v365_v20 = vmul.f32 %v1828_v11, %v2238_v45  ;;  %v362_v46 = vmul.f32 %v1827_v14, %v2108_v56  ;;  %v363_v6 = vmul.f32 %v1828_v11, %v2242_v54 }
 0x131   :  { %v269_v1 = vpop.permute.xlu0 %268  ;;  %v223_v2 = vadd.f32 %v219_v58, %v186_v28  ;;  %v224_v26 = vadd.f32 %v220_v53, %v187_v38  ;;  %v222_v4 = vadd.f32 %v218_v61, %v185_v50  ;;  %v263_v5 = vpop.permute.xlu1 %262  ;;  %v221_v43 = vadd.f32 %v217_v57, %v184_v3 }
 0x132   :  { %v274_v13 = vsel %vm124_vm2, %v2296_v27, %v269_v1  ;;  %v275_v24 = vsel %vm124_vm2, %v269_v1, %v2300_v30  ;;  %v272_v33 = vsel %vm124_vm2, %v2292_v15, %v263_v5  ;;  %v273_v40 = vsel %vm124_vm2, %v263_v5, %v2294_v25 }
 0x133   :  { %v282_v39 = vadd.f32 %v274_v13, %v223_v2  ;;  %v283_v49 = vadd.f32 %v275_v24, %v224_v26  ;;  %v280_v27 = vadd.f32 %v272_v33, %v221_v43  ;;  %v281_v58 = vadd.f32 %v273_v40, %v222_v4 }
 0x135   :  { %v318_v53 = vpop.permute.xlu0 %317  ;;  %v312_v30 = vpop.permute.xlu1 %311 }
 0x136   :  { %v323_v15 = vsel %vm175_vm3, %v2304_v35, %v318_v53  ;;  %v324_v25 = vsel %vm175_vm3, %v318_v53, %v2308_v41  ;;  %v321_v62 = vsel %vm175_vm3, %v2298_v29, %v312_v30  ;;  %v322_v56 = vsel %vm175_vm3, %v312_v30, %v2302_v31  ;;  %v1835_v35 = vld [vmem:[%s3230_s1 + $0x90] sm:$0xff]  ;;  %v1836_v29 = vld [vmem:[%s3230_s1 + $0x98] sm:$0xff] }
 0x137   :  { %v331_v45 = vadd.f32 %v323_v15, %v282_v39  ;;  %v332_v54 = vadd.f32 %v324_v25, %v283_v49  ;;  %v329_v57 = vadd.f32 %v321_v62, %v280_v27  ;;  %v330_v61 = vadd.f32 %v322_v56, %v281_v58  ;;  %v1842_v30 = vld [vmem:[%s3231_s0 + $0x3d] ss:$4 sm:$0x7] }
 0x138   :  { %v509_v38 = vmul.f32 %v1835_v35, %v2173_v16  ;;  %v510_v3 = vmul.f32 %v1836_v29, %v2259_v59  ;;  %v507_v50 = vmul.f32 %v1835_v35, %v2158_v10  ;;  %v508_v1 = vmul.f32 %v1836_v29, %v2263_v60 }
 0x139   :  { %v414_v63 = vpop.permute.xlu0 %413  ;;  %v368_v0 = vadd.f32 %v364_v52, %v331_v45  ;;  %v369_v9 = vadd.f32 %v365_v20, %v332_v54  ;;  %v367_v12 = vadd.f32 %v363_v6, %v330_v61  ;;  %v408_v7 = vpop.permute.xlu1 %407  ;;  %v366_v8 = vadd.f32 %v362_v46, %v329_v57  ;;  %v1847_v57 = vld [vmem:[%s3230_s1 + $0x100] sm:$0xff] }
 0x13a   :  { %v419_v31 = vsel %vm124_vm2, %v2312_v17, %v414_v63  ;;  %v420_v41 = vsel %vm124_vm2, %v414_v63, %v2316_v48  ;;  %v417_v44 = vsel %vm124_vm2, %v2306_v36, %v408_v7  ;;  %v418_v28 = vsel %vm124_vm2, %v408_v7, %v2310_v42  ;;  %v1848_v63 = vld [vmem:[%s3230_s1 + $0x108] sm:$0xff] }
 0x13b   :  { %v427_v2 = vadd.f32 %v419_v31, %v368_v0  ;;  %v428_v26 = vadd.f32 %v420_v41, %v369_v9  ;;  %v425_v17 = vadd.f32 %v417_v44, %v366_v8  ;;  %v426_v4 = vadd.f32 %v418_v28, %v367_v12 }
 0x13c   :  { %v2463_v25 = vrot.slane %v1842_v30, %v2187_v37  ;;  %v2467_v62 = vrot.slane %v1842_v30, %v2000_v18  ;;  %v670_v54 = vrot.slane %v1842_v30, %v2012_v21 }
 0x13d   :  { %v463_v5 = vpop.permute.xlu0 %462  ;;  %v457_v48 = vpop.permute.xlu1 %456 }
 0x13e   :  { %v468_v36 = vsel %vm175_vm3, %v2320_v19, %v463_v5  ;;  %v469_v42 = vsel %vm175_vm3, %v463_v5, %v2324_v32  ;;  %v466_v16 = vsel %vm175_vm3, %v2314_v47, %v457_v48  ;;  %v467_v10 = vsel %vm175_vm3, %v457_v48, %v2318_v22  ;;  %v1841_v22 = vld [vmem:[%s3231_s0 + $0xd] ss:$4 sm:$0x7] }
 0x13f   :  { %v476_v59 = vadd.f32 %v468_v36, %v427_v2  ;;  %v477_v60 = vadd.f32 %v469_v42, %v428_v26  ;;  %v474_v43 = vadd.f32 %v466_v16, %v425_v17  ;;  %v475_v14 = vadd.f32 %v467_v10, %v426_v4  ;;  %v1854_v26 = vld [vmem:[%s3230_s1 + $0xe8] sm:$0xff] }
 0x140   :  { %v2446_v52 = vrot.slane %v1841_v22, %v2000_v18  ;;  %v666_v39 = vrot.slane %v1841_v22, %v2012_v21  ;;  %v2454_v27 = vrot.slane %v1841_v22, %v2187_v37  ;;  %v1849_v36 = vld [vmem:[%s3231_s0 + $0xe] ss:$4 sm:$0x7] }
 0x141   :  { %v2426_v11 = vpop.permute.xlu0 %558  ;;  %v2428_v13 = vadd.f32 %v509_v38, %v476_v59  ;;  %v2430_v24 = vadd.f32 %v510_v3, %v477_v60  ;;  %v2432_v19 = vadd.f32 %v508_v1, %v475_v14  ;;  %v2434_v33 = vpop.permute.xlu1 %552  ;;  %v2436_v32 = vadd.f32 %v507_v50, %v474_v43  ;;  %v1853_v1 = vld [vmem:[%s3230_s1 + $0xe0] sm:$0xff] }
 0x142   :  { %v2528_v16 = vrot.slane %v1849_v36, %v2000_v18  ;;  %v811_v43 = vrot.slane %v1849_v36, %v2012_v21  ;;  %v2536_v22 = vrot.slane %v1849_v36, %v2187_v37 }
 0x145   :  { %v2438_v47 = vpop.permute.xlu0 %607  ;;  %v2440_v40 = vpop.permute.xlu1 %601 }
 0x149   :  { %v676_v20 = vpop.permute.xlu0 %675  ;;  %v2448_v46 = vpop.permute.xlu1 %609 }
 0x14a   :  { %v683_v6 = vmul.f32 %v676_v20, %v2446_v52  ;;  %v686_v45 = vmul.f32 %v676_v20, %v2467_v62 }
 0x14c   :  { %695 = vrot.lane.b32.xlu0 %v683_v6, %s1911_s25 }
 0x14d   :  { %v678_v49 = vpop.permute.xlu1 %677 }
 0x14e   :  { %v685_v58 = vmul.f32 %v678_v49, %v666_v39  ;;  %v679_v53 = vsel %vm95_vm0, %v676_v20, %v678_v49  ;;  %v688_v61 = vmul.f32 %v678_v49, %v670_v54 }
 0x14f   :  { %v684_v15 = vmul.f32 %v679_v53, %v2454_v27  ;;  %v687_v56 = vmul.f32 %v679_v53, %v2463_v25 }
 0x150   :  { %699 = vrot.lane.b32.xlu0 %v685_v58, %s1911_s25 }
 0x151   :  { %697 = vrot.lane.b32.xlu1 %v684_v15, %s1911_s25 }
 0x154   :  { %703 = vrot.lane.b32.xlu0 %v687_v56, %s1911_s25 }
 0x155   :  { %701 = vrot.lane.b32.xlu1 %v686_v45, %s1911_s25  ;;  %v1855_v45 = vld [vmem:[%s3230_s1 + $0x110] sm:$0xff] }
 0x158   :  { %724 = vrot.lane.b32.xlu0 %v1847_v57, %s1910_s19  ;;  %v1856_v57 = vld [vmem:[%s3230_s1 + $0x118] sm:$0xff] }
 0x159   :  { %705 = vrot.lane.b32.xlu1 %v688_v61, %s1911_s25 }
 0x15d   :  { %726 = vrot.lane.b32.xlu1 %v1848_v63, %s1910_s19 }
 0x1be   :  { %v2483_v0 = vpop.permute.xlu0 %695 }
 0x1c2   :  { %v2485_v9 = vpop.permute.xlu0 %699 }
 0x1c3   :  { %v2487_v12 = vpop.permute.xlu1 %697 }
 0x1c6   :  { %v2489_v7 = vpop.permute.xlu0 %703 }
 0x1c7   :  { %v2491_v8 = vpop.permute.xlu1 %701 }
 0x1ca   :  { %v725_v35 = vpop.permute.xlu0 %724 }
 0x1cb   :  { %v2493_v29 = vpop.permute.xlu1 %705  ;;  %v732_v31 = vmul.f32 %v725_v35, %v2446_v52  ;;  %v735_v50 = vmul.f32 %v725_v35, %v2467_v62 }
 0x1cd   :  { %744 = vrot.lane.b32.xlu0 %v732_v31, %s1912_s28 }
 0x1cf   :  { %v727_v41 = vpop.permute.xlu1 %726 }
 0x1d0   :  { %v734_v44 = vmul.f32 %v727_v41, %v666_v39  ;;  %v728_v28 = vsel %vm146_vm1, %v725_v35, %v727_v41  ;;  %v737_v2 = vmul.f32 %v727_v41, %v670_v54  ;;  %v1850_v39 = vld [vmem:[%s3231_s0 + $0x3e] ss:$4 sm:$0x7] }
 0x1d1   :  { %v733_v38 = vmul.f32 %v728_v28, %v2454_v27  ;;  %v736_v3 = vmul.f32 %v728_v28, %v2463_v25  ;;  %v2545_v58 = vrot.slane %v1850_v39, %v2187_v37  ;;  %v788_v53 = vrot.slane %v1850_v39, %v2000_v18 }
 0x1d2   :  { %748 = vrot.lane.b32.xlu0 %v734_v44, %s1912_s28  ;;  %v815_v56 = vrot.slane %v1850_v39, %v2012_v21 }
 0x1d3   :  { %746 = vrot.lane.b32.xlu1 %v733_v38, %s1912_s28 }
 0x1d6   :  { %752 = vrot.lane.b32.xlu0 %v736_v3, %s1912_s28 }
 0x1d7   :  { %750 = vrot.lane.b32.xlu1 %v735_v50, %s1912_s28 }
 0x1da   :  { %820 = vrot.lane.b32.xlu0 %v1853_v1, %s1909_s14 }
 0x1db   :  { %754 = vrot.lane.b32.xlu1 %v737_v2, %s1912_s28 }
 0x1df   :  { %822 = vrot.lane.b32.xlu1 %v1854_v26, %s1909_s14 }
 0x23f   :  { %v2514_v17 = vpop.permute.xlu0 %744 }
 0x244   :  { %v2516_v4 = vpop.permute.xlu0 %748 }
 0x245   :  { %v2518_v5 = vpop.permute.xlu1 %746 }
 0x248   :  { %v2520_v48 = vpop.permute.xlu0 %752 }
 0x249   :  { %v2525_v42 = vpop.permute.xlu1 %750 }
 0x24c   :  { %v821_v10 = vpop.permute.xlu0 %820 }
 0x24d   :  { %v2530_v59 = vpop.permute.xlu1 %754  ;;  %v828_v60 = vmul.f32 %v821_v10, %v2528_v16  ;;  %v831_v15 = vmul.f32 %v821_v10, %v788_v53 }
 0x24f   :  { %840 = vrot.lane.b32.xlu0 %v828_v60, %s1911_s25 }
 0x251   :  { %v823_v14 = vpop.permute.xlu1 %822 }
 0x252   :  { %v830_v20 = vmul.f32 %v823_v14, %v811_v43  ;;  %v824_v6 = vsel %vm95_vm0, %v821_v10, %v823_v14  ;;  %v833_v54 = vmul.f32 %v823_v14, %v815_v56  ;;  %v1861_v10 = vld [vmem:[%s3230_s1 + $0x150] sm:$0xff]  ;;  %v564_v14 = vsel %vm124_vm2, %v2328_v51, %v2426_v11 }
 0x253   :  { %v829_v49 = vmul.f32 %v824_v6, %v2536_v22  ;;  %v832_v30 = vmul.f32 %v824_v6, %v2545_v58  ;;  %v2595_v6 = vld [vmem:[%s3230_s1 + $0xa0] sm:$0xff]  ;;  %v572_v39 = vadd.f32 %v564_v14, %v2428_v13  ;;  %v614_v51 = vsel %vm175_vm3, %v2438_v47, %v2448_v46 }
 0x254   :  { %844 = vrot.lane.b32.xlu0 %v830_v20, %s1911_s25  ;;  %v613_v20 = vsel %vm175_vm3, %v2342_v55, %v2438_v47  ;;  %v709_v13 = vsel %vm124_vm2, %v2491_v8, %v2489_v7  ;;  %v710_v46 = vsel %vm124_vm2, %v2489_v7, %v2493_v29  ;;  %v2628_v8 = vld [vmem:[%s3230_s1 + $0xb0] sm:$0xff]  ;;  %v2641_v7 = vld [vmem:[%s3230_s1 + $0xb8] sm:$0xff] }
 0x255   :  { %842 = vrot.lane.b32.xlu1 %v829_v49, %s1911_s25  ;;  %v565_v49 = vsel %vm124_vm2, %v2426_v11, %v2332_v34 }
 0x256   :  { %v573_v55 = vadd.f32 %v565_v49, %v2430_v24  ;;  %v758_v24 = vsel %vm175_vm3, %v2525_v42, %v2520_v48 }
 0x258   :  { %848 = vrot.lane.b32.xlu0 %v832_v30, %s1911_s25  ;;  %v621_v30 = vadd.f32 %v613_v20, %v572_v39  ;;  %v622_v34 = vadd.f32 %v614_v51, %v573_v55  ;;  %v1858_v51 = vld [vmem:[%s3231_s0 + $0x48] ss:$4 sm:$0x7] }
 0x259   :  { %846 = vrot.lane.b32.xlu1 %v831_v15, %s1911_s25  ;;  %v654_v15 = vmul.f32 %v2595_v6, %v2467_v62 }
 0x25b   :  { %v658_v11 = vadd.f32 %v654_v15, %v621_v30 }
 0x25c   :  { %869 = vrot.lane.b32.xlu0 %v1855_v45, %s1910_s19 }
 0x25d   :  { %850 = vrot.lane.b32.xlu1 %v833_v54, %s1911_s25  ;;  %v717_v47 = vadd.f32 %v709_v13, %v658_v11  ;;  %v2674_v11 = vrot.slane %v1858_v51, %v2187_v37 }
 0x261   :  { %871 = vrot.lane.b32.xlu1 %v1856_v57, %s1910_s19  ;;  %v766_v57 = vadd.f32 %v758_v24, %v717_v47 }
 0x2c1   :  { %v2562_v61 = vpop.permute.xlu0 %840 }
 0x2c6   :  { %v2564_v63 = vpop.permute.xlu0 %844 }
 0x2c7   :  { %v2566_v35 = vpop.permute.xlu1 %842 }
 0x2ca   :  { %v849_v31 = vpop.permute.xlu0 %848 }
 0x2cb   :  { %v847_v41 = vpop.permute.xlu1 %846 }
 0x2cc   :  { %v854_v29 = vsel %vm124_vm2, %v847_v41, %v849_v31 }
 0x2ce   :  { %v870_v44 = vpop.permute.xlu0 %869 }
 0x2cf   :  { %v851_v28 = vpop.permute.xlu1 %850  ;;  %v877_v38 = vmul.f32 %v870_v44, %v2528_v16  ;;  %v880_v36 = vmul.f32 %v870_v44, %v788_v53 }
 0x2d1   :  { %889 = vrot.lane.b32.xlu0 %v877_v38, %s1912_s28 }
 0x2d3   :  { %v872_v3 = vpop.permute.xlu1 %871 }
 0x2d4   :  { %v879_v50 = vmul.f32 %v872_v3, %v811_v43  ;;  %v873_v1 = vsel %vm146_vm1, %v870_v44, %v872_v3  ;;  %v882_v60 = vmul.f32 %v872_v3, %v815_v56  ;;  %v1862_v43 = vld [vmem:[%s3230_s1 + $0x158] sm:$0xff]  ;;  %v2610_v56 = vld [vmem:[%s3230_s1 + $0xa8] sm:$0xff]  ;;  %v759_v44 = vsel %vm175_vm3, %v2520_v48, %v2530_v59 }
 0x2d5   :  { %v878_v2 = vmul.f32 %v873_v1, %v2536_v22  ;;  %v881_v26 = vmul.f32 %v873_v1, %v2545_v58  ;;  %v655_v62 = vmul.f32 %v2610_v56, %v2463_v25  ;;  %v799_v25 = vmul.f32 %v2628_v8, %v788_v53  ;;  %v1857_v48 = vld [vmem:[%s3231_s0 + $0x18] ss:$4 sm:$0x7] }
 0x2d6   :  { %893 = vrot.lane.b32.xlu0 %v879_v50, %s1912_s28  ;;  %v800_v53 = vmul.f32 %v2641_v7, %v2545_v58  ;;  %v2654_v41 = vrot.slane %v1857_v48, %v2000_v18  ;;  %v2659_v30 = vrot.slane %v1857_v48, %v2012_v21 }
 0x2d7   :  { %891 = vrot.lane.b32.xlu1 %v878_v2, %s1912_s28  ;;  %v659_v54 = vadd.f32 %v655_v62, %v622_v34  ;;  %v803_v1 = vadd.f32 %v799_v25, %v766_v57  ;;  %v2678_v62 = vrot.slane %v1858_v51, %v2000_v18  ;;  %v1864_v25 = vld [vmem:[%s3230_s1 + $0x188] sm:$0xff] }
 0x2d9   :  { %v718_v42 = vadd.f32 %v710_v46, %v659_v54  ;;  %v862_v59 = vadd.f32 %v854_v29, %v803_v1  ;;  %v2684_v46 = vrot.slane %v1858_v51, %v2012_v21  ;;  %v1863_v54 = vld [vmem:[%s3230_s1 + $0x180] sm:$0xff] }
 0x2da   :  { %897 = vrot.lane.b32.xlu0 %v881_v26, %s1912_s28 }
 0x2db   :  { %895 = vrot.lane.b32.xlu1 %v880_v36, %s1912_s28  ;;  %v767_v50 = vadd.f32 %v759_v44, %v718_v42  ;;  %v855_v36 = vsel %vm124_vm2, %v849_v31, %v851_v28  ;;  %v2665_v31 = vrot.slane %v1857_v48, %v2187_v37  ;;  %v562_v44 = vsel %vm124_vm2, %v2322_v23, %v2434_v33  ;;  %v3237_v42 = vld [vmem:[#allocation2_spill] sm:$0xff] }
 0x2dc   :  { %v563_v29 = vsel %vm124_vm2, %v2434_v33, %v3237_v42  ;;  %v570_v48 = vadd.f32 %v562_v44, %v2436_v32  ;;  %v652_v23 = vmul.f32 %v2595_v6, %v2446_v52  ;;  %v653_v33 = vmul.f32 %v2610_v56, %v2454_v27 }
 0x2dd   :  { %v757_v52 = vsel %vm175_vm3, %v2518_v5, %v2516_v4 }
 0x2de   :  { %965 = vrot.lane.b32.xlu0 %v1861_v10, %s1909_s14 }
 0x2df   :  { %899 = vrot.lane.b32.xlu1 %v882_v60, %s1912_s28  ;;  %v804_v60 = vadd.f32 %v800_v53, %v767_v50  ;;  %v3238_v50 = vld [vmem:[#allocation3_spill] sm:$0xff]  ;;  %v3239_v53 = vld [vmem:[#allocation4_spill] sm:$0xff] }
 0x2e0   :  { %v611_v1 = vsel %vm175_vm3, %v3238_v50, %v2440_v40 }
 0x2e1   :  { %v863_v20 = vadd.f32 %v855_v36, %v804_v60 }
 0x2e3   :  { %967 = vrot.lane.b32.xlu1 %v1862_v43, %s1909_s14 }
 0x343   :  { %v2617_v45 = vpop.permute.xlu0 %889 }
 0x348   :  { %v2634_v38 = vpop.permute.xlu0 %893 }
 0x349   :  { %v2636_v3 = vpop.permute.xlu1 %891 }
 0x34c   :  { %v898_v2 = vpop.permute.xlu0 %897 }
 0x34d   :  { %v896_v26 = vpop.permute.xlu1 %895 }
 0x34e   :  { %v903_v10 = vsel %vm175_vm3, %v896_v26, %v898_v2  ;;  %v619_v26 = vadd.f32 %v611_v1, %v570_v48 }
 0x34f   :  { %v2651_v43 = vadd.f32 %v903_v10, %v862_v59  ;;  %v571_v59 = vadd.f32 %v563_v29, %v2432_v19  ;;  %v707_v10 = vsel %vm124_vm2, %v2483_v0, %v2487_v12  ;;  %v756_v19 = vsel %vm175_vm3, %v2514_v17, %v2518_v5 }
 0x350   :  { %v966_v14 = vpop.permute.xlu0 %965  ;;  %v656_v32 = vadd.f32 %v652_v23, %v619_v26  ;;  %v797_v0 = vmul.f32 %v2628_v8, %v2528_v16  ;;  %v853_v17 = vsel %vm124_vm2, %v2566_v35, %v2564_v63  ;;  %v901_v5 = vsel %vm175_vm3, %v2617_v45, %v2636_v3  ;;  %v1869_v23 = vld [vmem:[%s3230_s1 + $0x160] sm:$0xff] }
 0x351   :  { %v973_v58 = vmul.f32 %v966_v14, %v2654_v41  ;;  %v900_v39 = vpop.permute.xlu1 %899  ;;  %v976_v47 = vmul.f32 %v966_v14, %v2678_v62  ;;  %v902_v16 = vsel %vm175_vm3, %v2636_v3, %v2634_v38 }
 0x352   :  { %v904_v49 = vsel %vm175_vm3, %v898_v2, %v900_v39  ;;  %v612_v2 = vsel %vm175_vm3, %v2440_v40, %v3239_v53  ;;  %v708_v40 = vsel %vm124_vm2, %v2487_v12, %v2485_v9  ;;  %v715_v6 = vadd.f32 %v707_v10, %v656_v32 }
 0x353   :  { %v2661_v15 = vadd.f32 %v904_v49, %v863_v20  ;;  %985 = vrot.lane.b32.xlu0 %v973_v58, %s1911_s25  ;;  %v620_v36 = vadd.f32 %v612_v2, %v571_v59  ;;  %v798_v9 = vmul.f32 %v2641_v7, %v2536_v22  ;;  %v852_v12 = vsel %vm124_vm2, %v2562_v61, %v2566_v35  ;;  %v1859_v22 = vld [vmem:[%s3230_s1 + $0x120] sm:$0xff]  ;;  %v1860_v61 = vld [vmem:[%s3230_s1 + $0x128] sm:$0xff] }
 0x354   :  { %v764_v56 = vadd.f32 %v756_v19, %v715_v6  ;;  %v942_v39 = vmul.f32 %v1859_v22, %v2654_v41  ;;  %v943_v45 = vmul.f32 %v1860_v61, %v2665_v31  ;;  %v944_v51 = vmul.f32 %v1859_v22, %v2678_v62  ;;  %v1865_v19 = vld [vmem:[%s3231_s0 + $0x19] ss:$4 sm:$0x7] }
 0x355   :  { %v968_v28 = vpop.permute.xlu1 %967  ;;  %v657_v60 = vadd.f32 %v653_v33, %v620_v36 }
 0x356   :  { %v969_v55 = vsel %vm95_vm0, %v966_v14, %v968_v28  ;;  %v975_v13 = vmul.f32 %v968_v28, %v2659_v30  ;;  %v978_v57 = vmul.f32 %v968_v28, %v2684_v46  ;;  %v801_v4 = vadd.f32 %v797_v0, %v764_v56 }
 0x357   :  { %v974_v34 = vmul.f32 %v969_v55, %v2665_v31  ;;  %v977_v24 = vmul.f32 %v969_v55, %v2674_v11  ;;  %v716_v27 = vadd.f32 %v708_v40, %v657_v60  ;;  %v2794_v56 = vrot.slane %v1865_v19, %v2000_v18 }
 0x358   :  { %989 = vrot.lane.b32.xlu0 %v975_v13, %s1911_s25  ;;  %v860_v8 = vadd.f32 %v852_v12, %v801_v4  ;;  %v2805_v4 = vrot.slane %v1865_v19, %v2187_v37 }
 0x359   :  { %987 = vrot.lane.b32.xlu1 %v974_v34, %s1911_s25  ;;  %v765_v14 = vadd.f32 %v757_v52, %v716_v27 }
 0x35a   :  { %v909_v7 = vadd.f32 %v901_v5, %v860_v8 }
 0x35b   :  { %v802_v20 = vadd.f32 %v798_v9, %v765_v14 }
 0x35c   :  { %993 = vrot.lane.b32.xlu0 %v977_v24, %s1911_s25  ;;  %v946_v3 = vadd.f32 %v942_v39, %v909_v7  ;;  %v1872_v39 = vld [vmem:[%s3230_s1 + $0x198] sm:$0xff] }
 0x35d   :  { %991 = vrot.lane.b32.xlu1 %v976_v47, %s1911_s25  ;;  %v861_v63 = vadd.f32 %v853_v17, %v802_v20  ;;  %v2799_v17 = vrot.slane %v1865_v19, %v2012_v21 }
 0x35f   :  { %v910_v58 = vadd.f32 %v902_v16, %v861_v63  ;;  %v1866_v16 = vld [vmem:[%s3231_s0 + $0x49] ss:$4 sm:$0x7] }
 0x360   :  { %1014 = vrot.lane.b32.xlu0 %v1863_v54, %s1910_s19  ;;  %v948_v54 = vadd.f32 %v944_v51, %v2651_v43  ;;  %v2814_v63 = vrot.slane %v1866_v16, %v2187_v37  ;;  %v1886_v51 = vld [vmem:[%s3230_s1 + $0x1e8] sm:$0xff] }
 0x361   :  { %995 = vrot.lane.b32.xlu1 %v978_v57, %s1911_s25  ;;  %v947_v28 = vadd.f32 %v943_v45, %v910_v58  ;;  %v1871_v45 = vld [vmem:[%s3230_s1 + $0x190] sm:$0xff] }
 0x365   :  { %1016 = vrot.lane.b32.xlu1 %v1864_v25, %s1910_s19  ;;  %v945_v25 = vmul.f32 %v1860_v61, %v2674_v11 }
 0x367   :  { %v949_v1 = vadd.f32 %v945_v25, %v2661_v15  ;;  %v1902_v25 = vld [vmem:[%s3230_s1 + $0x208] sm:$0xff] }
 0x3c5   :  { %v986_v35 = vpop.permute.xlu0 %985 }
 0x3ca   :  { %v990_v49 = vpop.permute.xlu0 %989 }
 0x3cb   :  { %v988_v38 = vpop.permute.xlu1 %987 }
 0x3cc   :  { %v997_v55 = vsel %vm124_vm2, %v986_v35, %v988_v38  ;;  %v998_v13 = vsel %vm124_vm2, %v988_v38, %v990_v49  ;;  %v2818_v35 = vrot.slane %v1866_v16, %v2000_v18  ;;  %v1878_v49 = vld [vmem:[%s3230_s1 + $0x178] sm:$0xff]  ;;  %v1880_v38 = vld [vmem:[%s3230_s1 + $0x1a8] sm:$0xff] }
 0x3cd   :  { %v1005_v34 = vadd.f32 %v997_v55, %v946_v3  ;;  %v1006_v24 = vadd.f32 %v998_v13, %v947_v28  ;;  %v1877_v28 = vld [vmem:[%s3230_s1 + $0x170] sm:$0xff]  ;;  %v1879_v3 = vld [vmem:[%s3230_s1 + $0x1a0] sm:$0xff]  ;;  %v1888_v13 = vld [vmem:[%s3230_s1 + $0x218] sm:$0xff] }
 0x3ce   :  { %v994_v47 = vpop.permute.xlu0 %993  ;;  %v1885_v55 = vld [vmem:[%s3230_s1 + $0x1e0] sm:$0xff] }
 0x3cf   :  { %v992_v57 = vpop.permute.xlu1 %991 }
 0x3d0   :  { %v999_v44 = vsel %vm124_vm2, %v992_v57, %v994_v47  ;;  %v1895_v57 = vld [vmem:[%s3230_s1 + $0x220] sm:$0xff] }
 0x3d1   :  { %v1007_v42 = vadd.f32 %v999_v44, %v948_v54  ;;  %v1896_v54 = vld [vmem:[%s3230_s1 + $0x228] sm:$0xff]  ;;  %v1901_v44 = vld [vmem:[%s3230_s1 + $0x200] sm:$0xff] }
 0x3d2   :  { %v1015_v29 = vpop.permute.xlu0 %1014 }
 0x3d3   :  { %v1022_v50 = vmul.f32 %v1015_v29, %v2654_v41  ;;  %v996_v53 = vpop.permute.xlu1 %995  ;;  %v1025_v15 = vmul.f32 %v1015_v29, %v2678_v62 }
 0x3d4   :  { %v1000_v2 = vsel %vm124_vm2, %v994_v47, %v996_v53  ;;  %v1893_v47 = vld [vmem:[%s3230_s1 + $0x1f0] sm:$0xff] }
 0x3d5   :  { %v1008_v48 = vadd.f32 %v1000_v2, %v949_v1  ;;  %1034 = vrot.lane.b32.xlu0 %v1022_v50, %s1912_s28  ;;  %v1105_v50 = vrot.slane %v1866_v16, %v2012_v21  ;;  %v1867_v53 = vld [vmem:[%s3230_s1 + $0x130] sm:$0xff]  ;;  %v2905_v2 = vld [vmem:[%s3230_s1 + $0x138] sm:$0xff] }
 0x3d7   :  { %v1017_v59 = vpop.permute.xlu1 %1016 }
 0x3d8   :  { %v1018_v43 = vsel %vm146_vm1, %v1015_v29, %v1017_v59  ;;  %v1024_v26 = vmul.f32 %v1017_v59, %v2659_v30  ;;  %v1027_v30 = vmul.f32 %v1017_v59, %v2684_v46  ;;  %v1903_v29 = vld [vmem:[%s3230_s1 + $0x230] sm:$0xff]  ;;  %v1087_v59 = vmul.f32 %v1867_v53, %v2794_v56 }
 0x3d9   :  { %v1023_v36 = vmul.f32 %v1018_v43, %v2665_v31  ;;  %v1026_v41 = vmul.f32 %v1018_v43, %v2674_v11  ;;  %v1870_v31 = vld [vmem:[%s3230_s1 + $0x168] sm:$0xff]  ;;  %v1088_v43 = vmul.f32 %v2905_v2, %v2805_v4 }
 0x3da   :  { %1038 = vrot.lane.b32.xlu0 %v1024_v26, %s1912_s28 }
 0x3db   :  { %1036 = vrot.lane.b32.xlu1 %v1023_v36, %s1912_s28 }
 0x3de   :  { %1042 = vrot.lane.b32.xlu0 %v1026_v41, %s1912_s28 }
 0x3df   :  { %1040 = vrot.lane.b32.xlu1 %v1025_v15, %s1912_s28 }
 0x3e2   :  { %1110 = vrot.lane.b32.xlu0 %v1869_v23, %s1909_s14  ;;  %v1089_v23 = vmul.f32 %v1867_v53, %v2818_v35 }
 0x3e3   :  { %1044 = vrot.lane.b32.xlu1 %v1027_v30, %s1912_s28 }
 0x3e7   :  { %1112 = vrot.lane.b32.xlu1 %v1870_v31, %s1909_s14 }
 0x447   :  { %v1035_v11 = vpop.permute.xlu0 %1034 }
 0x44c   :  { %v1039_v62 = vpop.permute.xlu0 %1038 }
 0x44d   :  { %v1037_v33 = vpop.permute.xlu1 %1036 }
 0x44e   :  { %v1046_v10 = vsel %vm175_vm3, %v1035_v11, %v1037_v33  ;;  %v1047_v40 = vsel %vm175_vm3, %v1037_v33, %v1039_v62 }
 0x44f   :  { %v2783_v60 = vadd.f32 %v1046_v10, %v1005_v34  ;;  %v2785_v46 = vadd.f32 %v1047_v40, %v1006_v24  ;;  %v1887_v34 = vld [vmem:[%s3230_s1 + $0x210] sm:$0xff]  ;;  %v1894_v24 = vld [vmem:[%s3230_s1 + $0x1f8] sm:$0xff] }
 0x450   :  { %v1043_v32 = vpop.permute.xlu0 %1042 }
 0x451   :  { %v1041_v52 = vpop.permute.xlu1 %1040  ;;  %v1092_v36 = vadd.f32 %v1088_v43, %v2785_v46  ;;  %v1091_v15 = vadd.f32 %v1087_v59, %v2783_v60  ;;  %v1090_v43 = vmul.f32 %v2905_v2, %v2814_v63 }
 0x452   :  { %v1048_v6 = vsel %vm175_vm3, %v1041_v52, %v1043_v32 }
 0x453   :  { %v2791_v27 = vadd.f32 %v1048_v6, %v1007_v42  ;;  %v1904_v42 = vld [vmem:[%s3230_s1 + $0x238] sm:$0xff] }
 0x454   :  { %v1111_v14 = vpop.permute.xlu0 %1110 }
 0x455   :  { %v1118_v0 = vmul.f32 %v1111_v14, %v2794_v56  ;;  %v1045_v9 = vpop.permute.xlu1 %1044  ;;  %v1121_v58 = vmul.f32 %v1111_v14, %v2818_v35  ;;  %v1093_v10 = vadd.f32 %v1089_v23, %v2791_v27  ;;  %v1873_v27 = vld [vmem:[%s3231_s0 + $0x1a] ss:$4 sm:$0x7] }
 0x456   :  { %v1049_v12 = vsel %vm175_vm3, %v1043_v32, %v1045_v9  ;;  %v2937_v16 = vrot.slane %v1873_v27, %v2000_v18 }
 0x457   :  { %v2801_v20 = vadd.f32 %v1049_v12, %v1008_v48  ;;  %1130 = vrot.lane.b32.xlu0 %v1118_v0, %s1911_s25 }
 0x459   :  { %v1113_v5 = vpop.permute.xlu1 %1112 }
 0x45a   :  { %v1114_v22 = vsel %vm95_vm0, %v1111_v14, %v1113_v5  ;;  %v1120_v61 = vmul.f32 %v1113_v5, %v2799_v17  ;;  %v1123_v1 = vmul.f32 %v1113_v5, %v1105_v50 }
 0x45b   :  { %v1119_v8 = vmul.f32 %v1114_v22, %v2805_v4  ;;  %v1122_v7 = vmul.f32 %v1114_v22, %v2814_v63 }
 0x45c   :  { %1134 = vrot.lane.b32.xlu0 %v1120_v61, %s1911_s25 }
 0x45d   :  { %1132 = vrot.lane.b32.xlu1 %v1119_v8, %s1911_s25 }
 0x460   :  { %1138 = vrot.lane.b32.xlu0 %v1122_v7, %s1911_s25 }
 0x461   :  { %1136 = vrot.lane.b32.xlu1 %v1121_v58, %s1911_s25 }
 0x464   :  { %1161 = vrot.lane.b32.xlu0 %v1872_v39, %s1910_s19  ;;  %v1246_v39 = vrot.slane %v1873_v27, %v2012_v21 }
 0x465   :  { %1159 = vrot.lane.b32.xlu1 %v1871_v45, %s1910_s19 }
 0x468   :  { %1257 = vrot.lane.b32.xlu0 %v1878_v49, %s1909_s14 }
 0x469   :  { %1255 = vrot.lane.b32.xlu1 %v1877_v28, %s1909_s14 }
 0x46c   :  { %1306 = vrot.lane.b32.xlu0 %v1880_v38, %s1910_s19 }
 0x46d   :  { %1304 = vrot.lane.b32.xlu1 %v1879_v3, %s1910_s19 }
 0x470   :  { %1402 = vrot.lane.b32.xlu0 %v1886_v51, %s1909_s14 }
 0x471   :  { %1400 = vrot.lane.b32.xlu1 %v1885_v55, %s1909_s14 }
 0x474   :  { %1451 = vrot.lane.b32.xlu0 %v1888_v13, %s1910_s19 }
 0x475   :  { %1449 = vrot.lane.b32.xlu1 %v1887_v34, %s1910_s19 }
 0x478   :  { %1547 = vrot.lane.b32.xlu0 %v1894_v24, %s1909_s14 }
 0x479   :  { %1545 = vrot.lane.b32.xlu1 %v1893_v47, %s1909_s14 }
 0x47c   :  { %1596 = vrot.lane.b32.xlu0 %v1896_v54, %s1910_s19 }
 0x47d   :  { %1594 = vrot.lane.b32.xlu1 %v1895_v57, %s1910_s19 }
 0x480   :  { %1692 = vrot.lane.b32.xlu0 %v1902_v25, %s1909_s14 }
 0x481   :  { %1690 = vrot.lane.b32.xlu1 %v1901_v44, %s1909_s14  ;;  %v1881_v44 = vld [vmem:[%s3231_s0 + $0x24] ss:$4 sm:$0x7] }
 0x482   :  { %v2987_v53 = vrot.slane %v1881_v44, %v2000_v18  ;;  %v2994_v59 = vrot.slane %v1881_v44, %v2187_v37  ;;  %v1391_v2 = vrot.slane %v1881_v44, %v2012_v21 }
 0x484   :  { %1741 = vrot.lane.b32.xlu0 %v1904_v42, %s1910_s19 }
 0x485   :  { %1739 = vrot.lane.b32.xlu1 %v1903_v29, %s1910_s19 }
 0x489   :  { %1140 = vrot.lane.b32.xlu1 %v1123_v1, %s1911_s25 }
 0x4c9   :  { %v1131_v48 = vpop.permute.xlu0 %1130 }
 0x4ce   :  { %v1135_v26 = vpop.permute.xlu0 %1134 }
 0x4cf   :  { %v1133_v41 = vpop.permute.xlu1 %1132 }
 0x4d0   :  { %v1142_v30 = vsel %vm124_vm2, %v1131_v48, %v1133_v41  ;;  %v1143_v31 = vsel %vm124_vm2, %v1133_v41, %v1135_v26 }
 0x4d1   :  { %v2915_v11 = vadd.f32 %v1142_v30, %v1091_v15  ;;  %v2917_v62 = vadd.f32 %v1143_v31, %v1092_v36  ;;  %v1882_v15 = vld [vmem:[%s3231_s0 + $0x54] ss:$4 sm:$0x7]  ;;  %v1094_v31 = vadd.f32 %v1090_v43, %v2801_v20 }
 0x4d2   :  { %v2919_v33 = vpop.permute.xlu0 %1138 }
 0x4d3   :  { %v1137_v40 = vpop.permute.xlu1 %1136 }
 0x4d4   :  { %v1144_v46 = vsel %vm124_vm2, %v1137_v40, %v2919_v33  ;;  %v3012_v40 = vrot.slane %v1882_v15, %v2000_v18 }
 0x4d5   :  { %v2924_v32 = vadd.f32 %v1144_v46, %v1093_v10 }
 0x4d6   :  { %v1162_v60 = vpop.permute.xlu0 %1161 }
 0x4d7   :  { %v1160_v19 = vpop.permute.xlu1 %1159  ;;  %v1169_v9 = vmul.f32 %v1162_v60, %v2799_v17  ;;  %v1172_v8 = vmul.f32 %v1162_v60, %v1105_v50  ;;  %v1874_v17 = vld [vmem:[%s3231_s0 + $0x4a] ss:$4 sm:$0x7] }
 0x4d8   :  { %v1163_v52 = vsel %vm146_vm1, %v1160_v19, %v1162_v60  ;;  %v1167_v6 = vmul.f32 %v1160_v19, %v2794_v56  ;;  %v1170_v12 = vmul.f32 %v1160_v19, %v2818_v35  ;;  %v2955_v45 = vrot.slane %v1874_v17, %v2000_v18 }
 0x4d9   :  { %v1168_v14 = vmul.f32 %v1163_v52, %v2805_v4  ;;  %v2942_v4 = vrot.slane %v1873_v27, %v2187_v37  ;;  %v1171_v22 = vmul.f32 %v1163_v52, %v2814_v63  ;;  %v2962_v28 = vrot.slane %v1874_v17, %v2187_v37 }
 0x4da   :  { %1179 = vrot.lane.b32.xlu0 %v1167_v6, %s1912_s28  ;;  %v1258_v5 = vpop.permute.xlu0 %1257  ;;  %v1250_v51 = vrot.slane %v1874_v17, %v2012_v21  ;;  %v3019_v60 = vrot.slane %v1882_v15, %v2187_v37  ;;  %v1395_v52 = vrot.slane %v1882_v15, %v2012_v21 }
 0x4db   :  { %1181 = vrot.lane.b32.xlu1 %v1168_v14, %s1912_s28  ;;  %v1256_v0 = vpop.permute.xlu1 %1255  ;;  %v1265_v38 = vmul.f32 %v1258_v5, %v1246_v39 }
 0x4dc   :  { %v1259_v61 = vsel %vm95_vm0, %v1256_v0, %v1258_v5  ;;  %v1263_v35 = vmul.f32 %v1256_v0, %v2937_v16  ;;  %v1266_v3 = vmul.f32 %v1256_v0, %v2955_v45  ;;  %v1268_v47 = vmul.f32 %v1258_v5, %v1250_v51 }
 0x4dd   :  { %v1264_v7 = vmul.f32 %v1259_v61, %v2942_v4  ;;  %v1267_v34 = vmul.f32 %v1259_v61, %v2962_v28 }
 0x4de   :  { %1183 = vrot.lane.b32.xlu0 %v1169_v9, %s1912_s28  ;;  %v1307_v55 = vpop.permute.xlu0 %1306 }
 0x4df   :  { %1185 = vrot.lane.b32.xlu1 %v1170_v12, %s1912_s28  ;;  %v1305_v56 = vpop.permute.xlu1 %1304  ;;  %v1314_v29 = vmul.f32 %v1307_v55, %v1246_v39  ;;  %v1317_v41 = vmul.f32 %v1307_v55, %v1250_v51  ;;  %v1889_v12 = vld [vmem:[%s3231_s0 + $0x25] ss:$4 sm:$0x7] }
 0x4e0   :  { %v1308_v24 = vsel %vm146_vm1, %v1305_v56, %v1307_v55  ;;  %v1312_v54 = vmul.f32 %v1305_v56, %v2937_v16  ;;  %v1315_v50 = vmul.f32 %v1305_v56, %v2955_v45  ;;  %v3041_v61 = vrot.slane %v1889_v12, %v2000_v18 }
 0x4e1   :  { %v1313_v57 = vmul.f32 %v1308_v24, %v2942_v4  ;;  %v1316_v26 = vmul.f32 %v1308_v24, %v2962_v28 }
 0x4e2   :  { %1187 = vrot.lane.b32.xlu0 %v1171_v22, %s1912_s28  ;;  %v1403_v1 = vpop.permute.xlu0 %1402 }
 0x4e3   :  { %1189 = vrot.lane.b32.xlu1 %v1172_v8, %s1912_s28  ;;  %v1401_v58 = vpop.permute.xlu1 %1400  ;;  %v1410_v19 = vmul.f32 %v1403_v1, %v1391_v2  ;;  %v1413_v27 = vmul.f32 %v1403_v1, %v1395_v52  ;;  %v3046_v8 = vrot.slane %v1889_v12, %v2187_v37 }
 0x4e4   :  { %v1404_v36 = vsel %vm95_vm0, %v1401_v58, %v1403_v1  ;;  %v1408_v23 = vmul.f32 %v1401_v58, %v2987_v53  ;;  %v1411_v20 = vmul.f32 %v1401_v58, %v3012_v40  ;;  %v1890_v58 = vld [vmem:[%s3231_s0 + $0x55] ss:$4 sm:$0x7] }
 0x4e5   :  { %v1409_v30 = vmul.f32 %v1404_v36, %v2994_v59  ;;  %v3066_v51 = vrot.slane %v1890_v58, %v2187_v37  ;;  %v1540_v24 = vrot.slane %v1890_v58, %v2012_v21 }
 0x4e6   :  { %1275 = vrot.lane.b32.xlu0 %v1263_v35, %s1911_s25  ;;  %v1452_v6 = vpop.permute.xlu0 %1451 }
 0x4e7   :  { %1277 = vrot.lane.b32.xlu1 %v1264_v7, %s1911_s25  ;;  %v2959_v49 = vpop.permute.xlu1 %1449  ;;  %v1459_v5 = vmul.f32 %v1452_v6, %v1391_v2  ;;  %v1462_v7 = vmul.f32 %v1452_v6, %v1395_v52 }
 0x4e8   :  { %v1453_v14 = vsel %vm146_vm1, %v2959_v49, %v1452_v6  ;;  %v1457_v0 = vmul.f32 %v2959_v49, %v2987_v53  ;;  %v1460_v56 = vmul.f32 %v2959_v49, %v3012_v40 }
 0x4e9   :  { %v1458_v9 = vmul.f32 %v1453_v14, %v2994_v59  ;;  %v1461_v17 = vmul.f32 %v1453_v14, %v3019_v60 }
 0x4ea   :  { %1279 = vrot.lane.b32.xlu0 %v1265_v38, %s1911_s25  ;;  %v1548_v22 = vpop.permute.xlu0 %1547  ;;  %v1536_v38 = vrot.slane %v1889_v12, %v2012_v21 }
 0x4eb   :  { %1281 = vrot.lane.b32.xlu1 %v1266_v3, %s1911_s25  ;;  %v2968_v13 = vpop.permute.xlu1 %1545  ;;  %v3061_v3 = vrot.slane %v1890_v58, %v2000_v18  ;;  %v1558_v44 = vmul.f32 %v1548_v22, %v1540_v24 }
 0x4ec   :  { %v1549_v35 = vsel %vm95_vm0, %v2968_v13, %v1548_v22  ;;  %v1553_v39 = vmul.f32 %v2968_v13, %v3041_v61  ;;  %v1555_v55 = vmul.f32 %v1548_v22, %v1536_v38 }
 0x4ed   :  { %v1554_v49 = vmul.f32 %v1549_v35, %v3046_v8 }
 0x4ee   :  { %1283 = vrot.lane.b32.xlu0 %v1267_v34, %s1911_s25  ;;  %v1556_v34 = vmul.f32 %v2968_v13, %v3061_v3 }
 0x4ef   :  { %1285 = vrot.lane.b32.xlu1 %v1268_v47, %s1911_s25  ;;  %v2976_v25 = vpop.permute.xlu1 %1594  ;;  %v1597_v47 = vpop.permute.xlu0 %1596 }
 0x4f0   :  { %v1604_v1 = vmul.f32 %v1597_v47, %v1536_v38  ;;  %v1605_v43 = vmul.f32 %v2976_v25, %v3061_v3 }
 0x4f2   :  { %1324 = vrot.lane.b32.xlu0 %v1312_v54, %s1912_s28  ;;  %v1557_v54 = vmul.f32 %v1549_v35, %v3066_v51 }
 0x4f3   :  { %1326 = vrot.lane.b32.xlu1 %v1313_v57, %s1912_s28  ;;  %v2983_v42 = vpop.permute.xlu1 %1690  ;;  %v1598_v57 = vsel %vm146_vm1, %v2976_v25, %v1597_v47 }
 0x4f4   :  { %v1603_v13 = vmul.f32 %v1598_v57, %v3046_v8  ;;  %v1606_v15 = vmul.f32 %v1598_v57, %v3066_v51 }
 0x4f6   :  { %1328 = vrot.lane.b32.xlu0 %v1314_v29, %s1912_s28  ;;  %v1602_v29 = vmul.f32 %v2976_v25, %v3041_v61  ;;  %v1898_v25 = vld [vmem:[%s3231_s0 + $0x56] ss:$4 sm:$0x7] }
 0x4f7   :  { %1330 = vrot.lane.b32.xlu1 %v1315_v50, %s1912_s28  ;;  %v2991_v48 = vpop.permute.xlu1 %1739  ;;  %v1897_v50 = vld [vmem:[%s3231_s0 + $0x26] ss:$4 sm:$0x7]  ;;  %v1685_v6 = vrot.slane %v1898_v25, %v2012_v21 }
 0x4f8   :  { %v1681_v2 = vrot.slane %v1897_v50, %v2012_v21 }
 0x4fa   :  { %1332 = vrot.lane.b32.xlu0 %v1316_v26, %s1912_s28  ;;  %v1693_v26 = vpop.permute.xlu0 %1692 }
 0x4fb   :  { %1334 = vrot.lane.b32.xlu1 %v1317_v41, %s1912_s28  ;;  %v1141_v63 = vpop.permute.xlu1 %1140  ;;  %v3094_v41 = vrot.slane %v1897_v50, %v2187_v37 }
 0x4fc   :  { %v1145_v10 = vsel %vm124_vm2, %v2919_v33, %v1141_v63  ;;  %v1412_v33 = vmul.f32 %v1404_v36, %v3019_v60  ;;  %v3089_v36 = vrot.slane %v1897_v50, %v2000_v18 }
 0x4fd   :  { %v3014_v46 = vadd.f32 %v1145_v10, %v1094_v31  ;;  %v3109_v10 = vrot.slane %v1898_v25, %v2000_v18 }
 0x4fe   :  { %1420 = vrot.lane.b32.xlu0 %v1408_v23, %s1911_s25  ;;  %v1694_v23 = vsel %vm95_vm0, %v2983_v42, %v1693_v26  ;;  %v1698_v31 = vmul.f32 %v2983_v42, %v3089_v36 }
 0x4ff   :  { %1422 = vrot.lane.b32.xlu1 %v1409_v30, %s1911_s25  ;;  %v1607_v30 = vmul.f32 %v1597_v47, %v1540_v24  ;;  %v1699_v63 = vmul.f32 %v1694_v23, %v3094_v41  ;;  %v1701_v52 = vmul.f32 %v2983_v42, %v3109_v10 }
 0x502   :  { %1424 = vrot.lane.b32.xlu0 %v1410_v19, %s1911_s25  ;;  %v3114_v19 = vrot.slane %v1898_v25, %v2187_v37  ;;  %v1747_v37 = vmul.f32 %v2991_v48, %v3089_v36 }
 0x503   :  { %1426 = vrot.lane.b32.xlu1 %v1411_v20, %s1911_s25  ;;  %v1700_v20 = vmul.f32 %v1693_v26, %v1681_v2 }
 0x504   :  { %v1702_v18 = vmul.f32 %v1694_v23, %v3114_v19 }
 0x506   :  { %1428 = vrot.lane.b32.xlu0 %v1412_v33, %s1911_s25  ;;  %v1742_v33 = vpop.permute.xlu0 %1741 }
 0x507   :  { %1430 = vrot.lane.b32.xlu1 %v1413_v27, %s1911_s25  ;;  %v1743_v14 = vsel %vm146_vm1, %v2991_v48, %v1742_v33  ;;  %v1703_v27 = vmul.f32 %v1693_v26, %v1685_v6  ;;  %v1749_v21 = vmul.f32 %v1742_v33, %v1681_v2  ;;  %v1752_v12 = vmul.f32 %v1742_v33, %v1685_v6  ;;  %v1884_v33 = vld [vmem:[%s3230_s1 + $0x1b8] sm:$0xff] }
 0x508   :  { %v1748_v42 = vmul.f32 %v1743_v14, %v3094_v41 }
 0x50a   :  { %1469 = vrot.lane.b32.xlu0 %v1457_v0, %s1912_s28  ;;  %v1750_v0 = vmul.f32 %v2991_v48, %v3109_v10  ;;  %v1876_v48 = vld [vmem:[%s3230_s1 + $0x148] sm:$0xff] }
 0x50b   :  { %1471 = vrot.lane.b32.xlu1 %v1458_v9, %s1912_s28  ;;  %v1751_v9 = vmul.f32 %v1743_v14, %v3114_v19 }
 0x50e   :  { %1473 = vrot.lane.b32.xlu0 %v1459_v5, %s1912_s28  ;;  %v1875_v5 = vld [vmem:[%s3230_s1 + $0x140] sm:$0xff] }
 0x50f   :  { %1475 = vrot.lane.b32.xlu1 %v1460_v56, %s1912_s28 }
 0x512   :  { %1477 = vrot.lane.b32.xlu0 %v1461_v17, %s1912_s28  ;;  %v1232_v17 = vmul.f32 %v1875_v5, %v2937_v16  ;;  %v1234_v16 = vmul.f32 %v1875_v5, %v2955_v45 }
 0x513   :  { %1479 = vrot.lane.b32.xlu1 %v1462_v7, %s1912_s28 }
 0x516   :  { %1565 = vrot.lane.b32.xlu0 %v1553_v39, %s1911_s25  ;;  %v1233_v39 = vmul.f32 %v1876_v48, %v2942_v4 }
 0x517   :  { %1567 = vrot.lane.b32.xlu1 %v1554_v49, %s1911_s25 }
 0x51a   :  { %1569 = vrot.lane.b32.xlu0 %v1555_v55, %s1911_s25 }
 0x51b   :  { %1571 = vrot.lane.b32.xlu1 %v1556_v34, %s1911_s25 }
 0x51e   :  { %1573 = vrot.lane.b32.xlu0 %v1557_v54, %s1911_s25 }
 0x51f   :  { %1575 = vrot.lane.b32.xlu1 %v1558_v44, %s1911_s25  ;;  %v1235_v44 = vmul.f32 %v1876_v48, %v2962_v28 }
 0x522   :  { %1614 = vrot.lane.b32.xlu0 %v1602_v29, %s1912_s28 }
 0x523   :  { %1616 = vrot.lane.b32.xlu1 %v1603_v13, %s1912_s28 }
 0x526   :  { %1618 = vrot.lane.b32.xlu0 %v1604_v1, %s1912_s28 }
 0x527   :  { %1620 = vrot.lane.b32.xlu1 %v1605_v43, %s1912_s28 }
 0x52a   :  { %1622 = vrot.lane.b32.xlu0 %v1606_v15, %s1912_s28 }
 0x52b   :  { %1624 = vrot.lane.b32.xlu1 %v1607_v30, %s1912_s28 }
 0x52e   :  { %1710 = vrot.lane.b32.xlu0 %v1698_v31, %s1911_s25 }
 0x52f   :  { %1712 = vrot.lane.b32.xlu1 %v1699_v63, %s1911_s25 }
 0x532   :  { %1714 = vrot.lane.b32.xlu0 %v1700_v20, %s1911_s25 }
 0x533   :  { %1716 = vrot.lane.b32.xlu1 %v1701_v52, %s1911_s25 }
 0x536   :  { %1718 = vrot.lane.b32.xlu0 %v1702_v18, %s1911_s25 }
 0x537   :  { %1720 = vrot.lane.b32.xlu1 %v1703_v27, %s1911_s25 }
 0x53a   :  { %1759 = vrot.lane.b32.xlu0 %v1747_v37, %s1912_s28  ;;  %v1378_v37 = vmul.f32 %v1884_v33, %v2994_v59 }
 0x53b   :  { %1761 = vrot.lane.b32.xlu1 %v1748_v42, %s1912_s28 }
 0x53e   :  { %1763 = vrot.lane.b32.xlu0 %v1749_v21, %s1912_s28 }
 0x53f   :  { %1765 = vrot.lane.b32.xlu1 %v1750_v0, %s1912_s28 }
 0x542   :  { %1767 = vrot.lane.b32.xlu0 %v1751_v9, %s1912_s28 }
 0x543   :  { %1769 = vrot.lane.b32.xlu1 %v1752_v12, %s1912_s28 }
 0x54c   :  { %v1180_v56 = vpop.permute.xlu0 %1179 }
 0x54d   :  { %v1182_v22 = vpop.permute.xlu1 %1181 }
 0x54e   :  { %v1191_v35 = vsel %vm175_vm3, %v1180_v56, %v1182_v22 }
 0x54f   :  { %v1199_v7 = vadd.f32 %v1191_v35, %v2915_v11 }
 0x550   :  { %v1184_v58 = vpop.permute.xlu0 %1183 }
 0x551   :  { %v1192_v49 = vsel %vm175_vm3, %v1182_v22, %v1184_v58  ;;  %v1186_v38 = vpop.permute.xlu1 %1185  ;;  %v1236_v55 = vadd.f32 %v1232_v17, %v1199_v7  ;;  %v1380_v17 = vmul.f32 %v1884_v33, %v3019_v60 }
 0x552   :  { %v1200_v34 = vadd.f32 %v1192_v49, %v2917_v62 }
 0x554   :  { %v1188_v24 = vpop.permute.xlu0 %1187  ;;  %v1237_v47 = vadd.f32 %v1233_v39, %v1200_v34 }
 0x555   :  { %v1193_v54 = vsel %vm175_vm3, %v1186_v38, %v1188_v24  ;;  %v1190_v57 = vpop.permute.xlu1 %1189 }
 0x556   :  { %v1201_v11 = vadd.f32 %v1193_v54, %v2924_v32  ;;  %v1194_v29 = vsel %vm175_vm3, %v1188_v24, %v1190_v57 }
 0x557   :  { %v1202_v4 = vadd.f32 %v1194_v29, %v3014_v46  ;;  %v1883_v46 = vld [vmem:[%s3230_s1 + $0x1b0] sm:$0xff] }
 0x558   :  { %v1276_v13 = vpop.permute.xlu0 %1275  ;;  %v1238_v50 = vadd.f32 %v1234_v16, %v1201_v11  ;;  %v1377_v6 = vmul.f32 %v1883_v46, %v2987_v53  ;;  %v1379_v56 = vmul.f32 %v1883_v46, %v3012_v40  ;;  %v1891_v40 = vld [vmem:[%s3230_s1 + $0x1c0] sm:$0xff]  ;;  %v1892_v11 = vld [vmem:[%s3230_s1 + $0x1c8] sm:$0xff] }
 0x559   :  { %v1278_v1 = vpop.permute.xlu1 %1277  ;;  %v1239_v43 = vadd.f32 %v1235_v44, %v1202_v4  ;;  %v1522_v44 = vmul.f32 %v1891_v40, %v3041_v61 }
 0x55a   :  { %v1287_v62 = vsel %vm124_vm2, %v1276_v13, %v1278_v1 }
 0x55b   :  { %v1295_v26 = vadd.f32 %v1287_v62, %v1236_v55 }
 0x55c   :  { %v1280_v15 = vpop.permute.xlu0 %1279 }
 0x55d   :  { %v1288_v45 = vsel %vm124_vm2, %v1278_v1, %v1280_v15  ;;  %v1282_v23 = vpop.permute.xlu1 %1281  ;;  %v1523_v1 = vmul.f32 %v1892_v11, %v3046_v8  ;;  %v1525_v8 = vmul.f32 %v1892_v11, %v3066_v51 }
 0x55e   :  { %v1296_v30 = vadd.f32 %v1288_v45, %v1237_v47 }
 0x560   :  { %v1284_v25 = vpop.permute.xlu0 %1283 }
 0x561   :  { %v1289_v28 = vsel %vm124_vm2, %v1282_v23, %v1284_v25  ;;  %v1286_v32 = vpop.permute.xlu1 %1285 }
 0x562   :  { %v1297_v31 = vadd.f32 %v1289_v28, %v1238_v50  ;;  %v1290_v63 = vsel %vm124_vm2, %v1284_v25, %v1286_v32  ;;  %v1524_v28 = vmul.f32 %v1891_v40, %v3061_v3 }
 0x563   :  { %v1298_v2 = vadd.f32 %v1290_v63, %v1239_v43 }
 0x564   :  { %v1325_v20 = vpop.permute.xlu0 %1324 }
 0x565   :  { %v1327_v52 = vpop.permute.xlu1 %1326 }
 0x566   :  { %v1336_v18 = vsel %vm175_vm3, %v1325_v20, %v1327_v52 }
 0x567   :  { %v1344_v14 = vadd.f32 %v1336_v18, %v1295_v26 }
 0x568   :  { %v1329_v27 = vpop.permute.xlu0 %1328 }
 0x569   :  { %v1337_v42 = vsel %vm175_vm3, %v1327_v52, %v1329_v27  ;;  %v1331_v21 = vpop.permute.xlu1 %1330  ;;  %v1381_v0 = vadd.f32 %v1377_v6, %v1344_v14 }
 0x56a   :  { %v1345_v9 = vadd.f32 %v1337_v42, %v1296_v30 }
 0x56c   :  { %v1333_v12 = vpop.permute.xlu0 %1332  ;;  %v1382_v5 = vadd.f32 %v1378_v37, %v1345_v9 }
 0x56d   :  { %v1338_v53 = vsel %vm175_vm3, %v1331_v21, %v1333_v12  ;;  %v1335_v22 = vpop.permute.xlu1 %1334  ;;  %v1899_v21 = vld [vmem:[%s3230_s1 + $0x1d0] sm:$0xff] }
 0x56e   :  { %v1346_v48 = vadd.f32 %v1338_v53, %v1297_v31  ;;  %v1339_v35 = vsel %vm175_vm3, %v1333_v12, %v1335_v22 }
 0x56f   :  { %v1347_v7 = vadd.f32 %v1339_v35, %v1298_v2 }
 0x570   :  { %v1421_v58 = vpop.permute.xlu0 %1420  ;;  %v1383_v59 = vadd.f32 %v1379_v56, %v1346_v48  ;;  %v1900_v56 = vld [vmem:[%s3230_s1 + $0x1d8] sm:$0xff] }
 0x571   :  { %v1423_v39 = vpop.permute.xlu1 %1422  ;;  %v1384_v49 = vadd.f32 %v1380_v17, %v1347_v7  ;;  %v1668_v35 = vmul.f32 %v1900_v56, %v3094_v41  ;;  %v1670_v41 = vmul.f32 %v1900_v56, %v3114_v19 }
 0x572   :  { %v1432_v47 = vsel %vm124_vm2, %v1421_v58, %v1423_v39 }
 0x573   :  { %v1440_v60 = vadd.f32 %v1432_v47, %v1381_v0 }
 0x574   :  { %v1425_v38 = vpop.permute.xlu0 %1424 }
 0x575   :  { %v1427_v55 = vpop.permute.xlu1 %1426  ;;  %v1433_v54 = vsel %vm124_vm2, %v1423_v39, %v1425_v38 }
 0x576   :  { %v1441_v13 = vadd.f32 %v1433_v54, %v1382_v5  ;;  %v1667_v5 = vmul.f32 %v1899_v21, %v3089_v36 }
 0x578   :  { %v1429_v34 = vpop.permute.xlu0 %1428 }
 0x579   :  { %v1431_v24 = vpop.permute.xlu1 %1430  ;;  %v1434_v43 = vsel %vm124_vm2, %v1427_v55, %v1429_v34 }
 0x57a   :  { %v1435_v45 = vsel %vm124_vm2, %v1429_v34, %v1431_v24  ;;  %v1442_v23 = vadd.f32 %v1434_v43, %v1383_v59  ;;  %v1669_v24 = vmul.f32 %v1899_v21, %v3109_v10 }
 0x57b   :  { %v1443_v32 = vadd.f32 %v1435_v45, %v1384_v49 }
 0x57c   :  { %v1470_v16 = vpop.permute.xlu0 %1469 }
 0x57d   :  { %v1472_v57 = vpop.permute.xlu1 %1471 }
 0x57e   :  { %v1481_v29 = vsel %vm175_vm3, %v1470_v16, %v1472_v57 }
 0x57f   :  { %v1489_v4 = vadd.f32 %v1481_v29, %v1440_v60 }
 0x580   :  { %v1474_v50 = vpop.permute.xlu0 %1473 }
 0x581   :  { %v1482_v62 = vsel %vm175_vm3, %v1472_v57, %v1474_v50  ;;  %v1476_v26 = vpop.permute.xlu1 %1475  ;;  %v1526_v15 = vadd.f32 %v1522_v44, %v1489_v4 }
 0x582   :  { %v1490_v61 = vadd.f32 %v1482_v62, %v1441_v13 }
 0x584   :  { %v1478_v30 = vpop.permute.xlu0 %1477  ;;  %v1527_v25 = vadd.f32 %v1523_v1, %v1490_v61 }
 0x585   :  { %v1483_v31 = vsel %vm175_vm3, %v1476_v26, %v1478_v30  ;;  %v1480_v63 = vpop.permute.xlu1 %1479 }
 0x586   :  { %v1491_v46 = vadd.f32 %v1483_v31, %v1442_v23  ;;  %v1484_v2 = vsel %vm175_vm3, %v1478_v30, %v1480_v63 }
 0x587   :  { %v1492_v20 = vadd.f32 %v1484_v2, %v1443_v32 }
 0x588   :  { %v1566_v52 = vpop.permute.xlu0 %1565  ;;  %v1528_v6 = vadd.f32 %v1524_v28, %v1491_v46 }
 0x589   :  { %v1568_v33 = vpop.permute.xlu1 %1567  ;;  %v1529_v18 = vadd.f32 %v1525_v8, %v1492_v20 }
 0x58a   :  { %v1577_v3 = vsel %vm124_vm2, %v1566_v52, %v1568_v33 }
 0x58b   :  { %v1585_v51 = vadd.f32 %v1577_v3, %v1526_v15 }
 0x58c   :  { %v1570_v14 = vpop.permute.xlu0 %1569 }
 0x58d   :  { %v1572_v27 = vpop.permute.xlu1 %1571  ;;  %v1578_v9 = vsel %vm124_vm2, %v1568_v33, %v1570_v14 }
 0x58e   :  { %v1586_v17 = vadd.f32 %v1578_v9, %v1527_v25 }
 0x590   :  { %v1574_v37 = vpop.permute.xlu0 %1573 }
 0x591   :  { %v1576_v42 = vpop.permute.xlu1 %1575  ;;  %v1579_v7 = vsel %vm124_vm2, %v1572_v27, %v1574_v37 }
 0x592   :  { %v1580_v49 = vsel %vm124_vm2, %v1574_v37, %v1576_v42  ;;  %v1587_v38 = vadd.f32 %v1579_v7, %v1528_v6 }
 0x593   :  { %v1588_v47 = vadd.f32 %v1580_v49, %v1529_v18 }
 0x594   :  { %v1615_v0 = vpop.permute.xlu0 %1614 }
 0x595   :  { %v1617_v12 = vpop.permute.xlu1 %1616 }
 0x596   :  { %v1626_v53 = vsel %vm175_vm3, %v1615_v0, %v1617_v12 }
 0x597   :  { %v1634_v22 = vadd.f32 %v1626_v53, %v1585_v51 }
 0x598   :  { %v1619_v48 = vpop.permute.xlu0 %1618 }
 0x599   :  { %v1627_v58 = vsel %vm175_vm3, %v1617_v12, %v1619_v48  ;;  %v1621_v59 = vpop.permute.xlu1 %1620  ;;  %v1671_v39 = vadd.f32 %v1667_v5, %v1634_v22 }
 0x59a   :  { %v1635_v36 = vadd.f32 %v1627_v58, %v1586_v17 }
 0x59c   :  { %v1623_v55 = vpop.permute.xlu0 %1622  ;;  %v1672_v34 = vadd.f32 %v1668_v35, %v1635_v36 }
 0x59d   :  { %v1628_v40 = vsel %vm175_vm3, %v1621_v59, %v1623_v55  ;;  %v1625_v16 = vpop.permute.xlu1 %1624 }
 0x59e   :  { %v1636_v60 = vadd.f32 %v1628_v40, %v1587_v38  ;;  %v1629_v54 = vsel %vm175_vm3, %v1623_v55, %v1625_v16 }
 0x59f   :  { %v1637_v57 = vadd.f32 %v1629_v54, %v1588_v47 }
 0x5a0   :  { %v1711_v44 = vpop.permute.xlu0 %1710  ;;  %v1673_v11 = vadd.f32 %v1669_v24, %v1636_v60 }
 0x5a1   :  { %v1713_v29 = vpop.permute.xlu1 %1712  ;;  %v1674_v4 = vadd.f32 %v1670_v41, %v1637_v57 }
 0x5a2   :  { %v1722_v10 = vsel %vm124_vm2, %v1711_v44, %v1713_v29 }
 0x5a3   :  { %v1730_v26 = vadd.f32 %v1722_v10, %v1671_v39 }
 0x5a4   :  { %v1715_v13 = vpop.permute.xlu0 %1714 }
 0x5a5   :  { %v1717_v50 = vpop.permute.xlu1 %1716  ;;  %v1723_v15 = vsel %vm124_vm2, %v1713_v29, %v1715_v13 }
 0x5a6   :  { %v1731_v23 = vadd.f32 %v1723_v15, %v1672_v34 }
 0x5a8   :  { %v1719_v1 = vpop.permute.xlu0 %1718 }
 0x5a9   :  { %v1721_v43 = vpop.permute.xlu1 %1720  ;;  %v1724_v25 = vsel %vm124_vm2, %v1717_v50, %v1719_v1 }
 0x5aa   :  { %v1725_v31 = vsel %vm124_vm2, %v1719_v1, %v1721_v43  ;;  %v1732_v8 = vadd.f32 %v1724_v25, %v1673_v11 }
 0x5ab   :  { %v1733_v2 = vadd.f32 %v1725_v31, %v1674_v4 }
 0x5ac   :  { %v1760_v62 = vpop.permute.xlu0 %1759 }
 0x5ad   :  { %v1762_v45 = vpop.permute.xlu1 %1761 }
 0x5ae   :  { %v1771_v19 = vsel %vm175_vm3, %v1760_v62, %v1762_v45 }
 0x5af   :  { %v1779_v61 = vadd.f32 %v1771_v19, %v1730_v26 }
 0x5b0   :  { %v1764_v30 = vpop.permute.xlu0 %1763 }
 0x5b1   :  { %1783 = vst [vmem:[%s3233_s3] sm:$0xff] %v1779_v61  ;;  %v1772_v28 = vsel %vm175_vm3, %v1762_v45, %v1764_v30  ;;  %v1766_v32 = vpop.permute.xlu1 %1765 }
 0x5b2   :  { %v1780_v63 = vadd.f32 %v1772_v28, %v1731_v23 }
 0x5b4   :  { %1784 = vst [vmem:[%s3233_s3 + $0x8] sm:$0xff] %v1780_v63  ;;  %v1768_v46 = vpop.permute.xlu0 %1767 }
 0x5b5   :  { %v1773_v20 = vsel %vm175_vm3, %v1766_v32, %v1768_v46  ;;  %v1770_v52 = vpop.permute.xlu1 %1769 }
 0x5b6   :  { %v1781_v6 = vadd.f32 %v1773_v20, %v1732_v8  ;;  %v1774_v33 = vsel %vm175_vm3, %v1768_v46, %v1770_v52 }
 0x5b7   :  { %v1782_v18 = vadd.f32 %v1774_v33, %v1733_v2 }
 0x5b8   :  { %1785 = vst [vmem:[%s3233_s3 + $0x10] sm:$0xff] %v1781_v6 }
 0x5b9   :  { %1786 = vst [vmem:[%s3233_s3 + $0x18] sm:$0xff] %v1782_v18 }

</bundles_post_ra>
